<compile_context>
chip_gen: v6e
topology: v6e:2x2x1
jax: 0.10.0
libtpu: 0.0.40
codegen_flags: <defaults>
</compile_context>

<pallas_src>
import math
import functools

import jax
import jax.numpy as jnp
from jax.experimental import pallas as pl
from jax.experimental.pallas import tpu as pltpu

LOG_SQRT_2PI = math.log(math.sqrt(2.0 * math.pi))


def _fold_partial(terms):
    """Reduce a 2-D tile of per-element terms to a (<=8, <=128) partial using only VPU adds."""
    r, c = terms.shape
    if r > 8:
        if r % 8 != 0:                               # unaligned fallback
            return jnp.sum(terms, keepdims=True)
        acc = terms[0:8, :]
        for s in range(8, r, 8):
            acc = acc + terms[s:s + 8, :]
        terms = acc
    r, c = terms.shape
    if c > 128:
        if c % 128 != 0:
            return jnp.sum(terms, keepdims=True)
        acc = terms[:, 0:128]
        for s in range(128, c, 128):
            acc = acc + terms[:, s:s + 128]
        terms = acc
    return terms


def _fold_cols(terms):
    """(8, C) -> (8, min(C,128)) column fold (C a multiple of 128 when > 128)."""
    c = terms.shape[1]
    if c <= 128:
        return terms
    acc = terms[:, 0:128]
    for s in range(128, c, 128):
        acc = acc + terms[:, s:s + 128]
    return acc


def _accumulate_partial(ref, folded):
    r, c = folded.shape
    ref[0:r, 0:c] = ref[0:r, 0:c] + folded


def _bayes_linear_kernel(pi, inv2s1, dinv, cratio,
                         x_ref, wmu_ref, wrho_ref, weps_ref,
                         bmu_ref, brho_ref, beps_ref,
                         y_ref, lp_ref, lvp_ref):
    i = pl.program_id(1)          # batch tile (middle axis, "arbitrary")
    k = pl.program_id(2)          # in_features (contraction) tile -- innermost, "arbitrary"
    f32 = jnp.float32

    def softplus(v):
        # overflow-safe softplus
        return jnp.maximum(v, 0.0) + jnp.log(1.0 + jnp.exp(-jnp.abs(v)))

    def mixture_logprob_terms(v):
        # log(pi*N(v;0,s1) + (1-pi)*N(v;0,s2))  minus the per-element constant
        #   = -v^2/(2 s1^2) + log(pi + (1-pi)(s1/s2) exp(-v^2 (1/(2 s2^2) - 1/(2 s1^2))))
        # one exp + one log per element; exponent always <= 0 for s2 < s1.  Requires pi > 0.
        v2 = v * v
        return -v2 * inv2s1 + jnp.log(pi + cratio * jnp.exp(-v2 * dinv))

    # ---- sample the weight tile (bf16 streams upcast to f32; needed every step for the matmul) ----
    wrho = wrho_ref[...].astype(f32)
    weps = weps_ref[...].astype(f32)
    w_sigma = softplus(wrho)
    w = wmu_ref[...].astype(f32) + w_sigma * weps            # (tout, tk), f32

    # ---- first contraction step: sample bias, seed y with it, zero the log-prob partials ----------
    @pl.when(k == 0)
    def _init():
        b_sigma = softplus(brho_ref[...])
        b = bmu_ref[...] + b_sigma * beps_ref[...]           # (1, tout), f32
        y_ref[...] = jnp.zeros(y_ref.shape, f32) + b         # broadcast over batch rows
        lp_ref[...] = jnp.zeros_like(lp_ref)
        lvp_ref[...] = jnp.zeros_like(lvp_ref)

    # ---- bias log-probs: once per out tile (batch tile 0, first k step) ----------------------------
    @pl.when(jnp.logical_and(i == 0, k == 0))
    def _bias_log_probs():
        beps = beps_ref[...]
        b_sigma = softplus(brho_ref[...])
        b = bmu_ref[...] + b_sigma * beps
        lvp_t = -(jnp.log(b_sigma) + 0.5 * (beps * beps))
        lp_t = mixture_logprob_terms(b)
        _accumulate_partial(lvp_ref, _fold_partial(lvp_t))
        _accumulate_partial(lp_ref, _fold_partial(lp_t))

    # ---- MXU: y += x @ W.T  (bf16 feed, f32 accumulate in the resident output block) ---------------
    y_ref[...] += jax.lax.dot_general(
        x_ref[...], w.astype(jnp.bfloat16),
        dimension_numbers=(((1,), (1,)), ((), ())),
        preferred_element_type=f32)

    # ---- weight log-probs: each (out, in) weight element counted exactly once (batch tile 0) -------
    # Streamed in (8, tk) row slices folded immediately into an (8,128) accumulator so no
    # (tout, tk) f32 temporaries are materialized (avoids vreg spills on the heavy steps).
    @pl.when(i == 0)
    def _weight_log_probs():
        tout, tk = w.shape
        if tout % 8 == 0 and (tk <= 128 or tk % 128 == 0):
            lvp_acc = jnp.zeros((8, min(tk, 128)), f32)
            lp_acc = jnp.zeros((8, min(tk, 128)), f32)
            for r in range(0, tout, 8):
                sig_s = w_sigma[r:r + 8, :]
                eps_s = weps[r:r + 8, :]
                w_s = w[r:r + 8, :]
                # posterior: (w - mu)^2 / (2 sigma^2) == eps^2 / 2 exactly (reparameterization)
                lvp_acc = lvp_acc + _fold_cols(-(jnp.log(sig_s) + 0.5 * (eps_s * eps_s)))
                lp_acc = lp_acc + _fold_cols(mixture_logprob_terms(w_s))
            _accumulate_partial(lvp_ref, lvp_acc)
            _accumulate_partial(lp_ref, lp_acc)
        else:  # unaligned fallback (full-tile fold)
            _accumulate_partial(lvp_ref, _fold_partial(-(jnp.log(w_sigma) + 0.5 * (weps * weps))))
            _accumulate_partial(lp_ref, _fold_partial(mixture_logprob_terms(w)))


def _pick_tile(dim, pref, align):
    """Largest tile <= pref that divides dim and is `align`-aligned; falls back to the full dim."""
    if dim <= pref:
        return dim
    t = (pref // align) * align
    while t >= align:
        if dim % t == 0:
            return t
        t -= align
    return dim


def _vmem_bytes_estimate(tb, tout, tk):
    """Rough double-buffered working-set estimate for the chosen tiles."""
    io = (2 * tb * tk * 2              # x (bf16)
          + 3 * 2 * tout * tk * 2      # weight mu / rho / eps (bf16)
          + 3 * 2 * tout * 4           # bias mu / rho / eps ((1, tout) f32)
          + 2 * tb * tout * 4          # y (f32)
          + 2 * 2 * 8 * 128 * 4)       # log-prob partials
    tmp = 5 * tout * tk * 4 + tb * tout * 4   # in-kernel f32/bf16 temporaries (sigma, W, casts)
    return io + tmp


def bayesian_linear(x, weight_mu, weight_rho, bias_mu, bias_rho, w_eps, b_eps,
                    pi=0.5, sigma_1=math.exp(-0.0), sigma_2=math.exp(-6.0),
                    block_b=None, block_out=None, block_in=None):
    """Forward of BayesianLinear with sample=True, calculate_log_probs=True.

    Returns (y, log_prior, log_variational_posterior).
    The eval path (weight = mu, bias = mu) is recovered by passing zero epsilons.  Requires pi > 0.
    """
    B, in_f = x.shape
    out_f = weight_mu.shape[0]
    f32, bf16 = jnp.float32, jnp.bfloat16

    # HBM-stream dtypes: the four weight-sized streams go in bf16 (halves dominant HBM traffic);
    # all sampling / log-prob math happens in f32 in-kernel.  Bias arrays are tiny -> keep f32.
    x_b = x.astype(bf16)
    wmu = weight_mu.astype(bf16)
    wrho = weight_rho.astype(bf16)
    weps = w_eps.astype(bf16)
    bmu = bias_mu.reshape(1, out_f).astype(f32)
    brho = bias_rho.reshape(1, out_f).astype(f32)
    beps = b_eps.reshape(1, out_f).astype(f32)

    # Per-generation VMEM sizing (v7x: 64 MiB/TC; v5e/v6e: 128 MiB).
    try:
        vmem_cap = int(pltpu.get_tpu_info().vmem_capacity_bytes)
    except Exception:
        vmem_cap = 64 * 1024 * 1024
    budget = max(vmem_cap - 16 * 1024 * 1024, 32 * 1024 * 1024)

    if block_b is not None or block_out is not None or block_in is not None:
        tb = block_b if block_b is not None else _pick_tile(B, 512, 8)
        tout = block_out if block_out is not None else _pick_tile(out_f, 512, 128)
        tk = block_in if block_in is not None else _pick_tile(in_f, 1024, 128)
    else:
        # Large default tiles (kernel is HBM-bound); shrink until the working set fits the budget.
        tb = tout = tk = None
        for pb, po, pk in ((512, 512, 1024), (512, 512, 512), (256, 512, 512),
                           (256, 256, 512), (128, 256, 512), (128, 256, 256),
                           (128, 128, 256), (64, 128, 128), (8, 128, 128)):
            tb = _pick_tile(B, pb, 8)
            tout = _pick_tile(out_f, po, 128)
            tk = _pick_tile(in_f, pk, 128)
            if _vmem_bytes_estimate(tb, tout, tk) <= budget:
                break
    assert B % tb == 0 and out_f % tout == 0 and in_f % tk == 0, "block sizes must divide the dims"
    n_i, n_j, n_k = B // tb, out_f // tout, in_f // tk

    est = _vmem_bytes_estimate(tb, tout, tk)
    vmem_limit = int(min(vmem_cap - 8 * 1024 * 1024,
                         max(est + 16 * 1024 * 1024, 32 * 1024 * 1024)))

    # Python-precomputed constants (kept off the per-element VPU/EUP path).
    pi_f, s1, s2 = float(pi), float(sigma_1), float(sigma_2)
    inv2s1 = 1.0 / (2.0 * s1 * s1)
    dinv = 1.0 / (2.0 * s2 * s2) - inv2s1          # > 0 for s2 < s1 -> exp never overflows
    cratio = (1.0 - pi_f) * (s1 / s2)

    kernel = functools.partial(_bayes_linear_kernel, pi_f, inv2s1, dinv, cratio)

    grid_spec = pltpu.PrefetchScalarGridSpec(
        num_scalar_prefetch=0,
        grid=(n_j, n_i, n_k),                                  # j outermost -> megacore shards over j
        in_specs=[
            pl.BlockSpec((tb, tk), lambda j, i, k: (i, k)),    # x (bf16)
            pl.BlockSpec((tout, tk), lambda j, i, k: (j, k)),  # weight mu (bf16)
            pl.BlockSpec((tout, tk), lambda j, i, k: (j, k)),  # weight rho (bf16)
            pl.BlockSpec((tout, tk), lambda j, i, k: (j, k)),  # weight eps (bf16)
            pl.BlockSpec((1, tout), lambda j, i, k: (0, j)),   # bias mu
            pl.BlockSpec((1, tout), lambda j, i, k: (0, j)),   # bias rho
            pl.BlockSpec((1, tout), lambda j, i, k: (0, j)),   # bias eps
        ],
        out_specs=[
            pl.BlockSpec((tb, tout), lambda j, i, k: (i, j)),  # y (resident across k)
            pl.BlockSpec((8, 128), lambda j, i, k: (i, j)),    # log-prior partials
            pl.BlockSpec((8, 128), lambda j, i, k: (i, j)),    # log-var-posterior partials
        ],
    )

    y, lp_part, lvp_part = pl.pallas_call(
        kernel,
        grid_spec=grid_spec,
        out_shape=(
            jax.ShapeDtypeStruct((B, out_f), f32),
            jax.ShapeDtypeStruct((n_i * 8, n_j * 128), f32),
            jax.ShapeDtypeStruct((n_i * 8, n_j * 128), f32),
        ),
        compiler_params=pltpu.CompilerParams(
            # Only j is "parallel": on v7x megacore splits over out-feature tiles so the i==0-gated
            # log-prob work is balanced across both TensorCores.
            dimension_semantics=("parallel", "arbitrary", "arbitrary"),
            vmem_limit_bytes=vmem_limit,
        ),
    )(x_b, wmu, wrho, weps, bmu, brho, beps)

    # Fold the per-element constants back in (N * const), then the single cross-lane reduce.
    n_total = out_f * in_f + out_f
    log_prior = jnp.sum(lp_part) + n_total * (-LOG_SQRT_2PI - math.log(s1))
    log_var_post = jnp.sum(lvp_part) + n_total * (-LOG_SQRT_2PI)
    return y, log_prior, log_var_post


# ----------------------------- pure-JAX references (for validation) ---------------------------------

def _reference(x, weight_mu, weight_rho, bias_mu, bias_rho, w_eps, b_eps,
               pi=0.5, sigma_1=math.exp(-0.0), sigma_2=math.exp(-6.0)):
    """f32 reference mirroring the PyTorch module formulas exactly."""
    w_sigma = jnp.log1p(jnp.exp(weight_rho))
    w = weight_mu + w_sigma * w_eps
    b_sigma = jnp.log1p(jnp.exp(bias_rho))
    b = bias_mu + b_sigma * b_eps
    y = x @ w.T + b

    def gauss_lp(v, mu, sigma):
        return (-LOG_SQRT_2PI - jnp.log(sigma) - (v - mu) ** 2 / (2.0 * sigma ** 2)).sum()

    lvp = gauss_lp(w, weight_mu, w_sigma) + gauss_lp(b, bias_mu, b_sigma)

    def mix_lp(v):
        lp1 = -LOG_SQRT_2PI - math.log(sigma_1) - v ** 2 / (2.0 * sigma_1 ** 2)
        lp2 = -LOG_SQRT_2PI - math.log(sigma_2) - v ** 2 / (2.0 * sigma_2 ** 2)
        return jnp.log(pi * jnp.exp(lp1) + (1.0 - pi) * jnp.exp(lp2)).sum()

    lp = mix_lp(w) + mix_lp(b)
    return y, lp, lvp


def _reference_kernel_numerics(x, weight_mu, weight_rho, bias_mu, bias_rho, w_eps, b_eps,
                               pi=0.5, sigma_1=math.exp(-0.0), sigma_2=math.exp(-6.0)):
    """Replicates the kernel's numerics: bf16 weight/eps/x streams, f32 math, bf16-fed MXU."""
    f32, bf16 = jnp.float32, jnp.bfloat16
    wmu = weight_mu.astype(bf16).astype(f32)
    wrho = weight_rho.astype(bf16).astype(f32)
    weps = w_eps.astype(bf16).astype(f32)
    bmu, brho, beps = bias_mu.astype(f32), bias_rho.astype(f32), b_eps.astype(f32)

    def softplus(v):
        return jnp.maximum(v, 0.0) + jnp.log(1.0 + jnp.exp(-jnp.abs(v)))

    w_sigma = softplus(wrho)
    w = wmu + w_sigma * weps
    b_sigma = softplus(brho)
    b = bmu + b_sigma * beps
    y = jax.lax.dot_general(x.astype(bf16), w.astype(bf16),
                            dimension_numbers=(((1,), (1,)), ((), ())),
                            preferred_element_type=f32) + b

    def gauss_lp(sigma, eps):
        return (-LOG_SQRT_2PI - jnp.log(sigma) - 0.5 * eps * eps).sum()

    lvp = gauss_lp(w_sigma, weps) + gauss_lp(b_sigma, beps)

    def mix_lp(v):
        lp1 = -LOG_SQRT_2PI - math.log(sigma_1) - v ** 2 / (2.0 * sigma_1 ** 2)
        lp2 = -LOG_SQRT_2PI - math.log(sigma_2) - v ** 2 / (2.0 * sigma_2 ** 2)
        return jnp.log(pi * jnp.exp(lp1) + (1.0 - pi) * jnp.exp(lp2)).sum()

    lp = mix_lp(w) + mix_lp(b)
    return y, lp, lvp


if __name__ == "__main__":
    # (8,128)-aligned small shapes; explicit blocks give a (2,2,2) grid exercising the batch-tile
    # gating, per-out-tile partials and k-accumulation; a second call exercises the default tiles.
    B, in_features, out_features = 32, 256, 256
    key = jax.random.PRNGKey(0)
    ks = jax.random.split(key, 7)

    weight_mu = jax.random.uniform(ks[0], (out_features, in_features), jnp.float32, -0.2, 0.2)
    weight_rho = jax.random.uniform(ks[1], (out_features, in_features), jnp.float32, -5.0, -4.0)
    bias_mu = jax.random.uniform(ks[2], (out_features,), jnp.float32, -0.2, 0.2)
    bias_rho = jax.random.uniform(ks[3], (out_features,), jnp.float32, -5.0, -4.0)
    w_eps = jax.random.normal(ks[4], (out_features, in_features), jnp.float32)
    b_eps = jax.random.normal(ks[5], (out_features,), jnp.float32)
    x = jax.random.normal(ks[6], (B, in_features), jnp.float32)

    y, log_prior, log_var_post = bayesian_linear(
        x, weight_mu, weight_rho, bias_mu, bias_rho, w_eps, b_eps,
        block_b=16, block_out=128, block_in=128)
    jax.block_until_ready((y, log_prior, log_var_post))

    y2, lp2, lvp2 = bayesian_linear(x, weight_mu, weight_rho, bias_mu, bias_rho, w_eps, b_eps)
    jax.block_until_ready((y2, lp2, lvp2))

    y_f32, lp_f32, lvp_f32 = _reference(x, weight_mu, weight_rho, bias_mu, bias_rho, w_eps, b_eps)
    y_kn, lp_kn, lvp_kn = _reference_kernel_numerics(
        x, weight_mu, weight_rho, bias_mu, bias_rho, w_eps, b_eps)

    for yy, lp, lvp in ((y, log_prior, log_var_post), (y2, lp2, lvp2)):
        # tight vs the kernel-numerics reference (same bf16 streams / bf16 MXU feed)
        assert jnp.allclose(yy, y_kn, atol=5e-3, rtol=5e-3), "y mismatch (kernel-numerics ref)"
        assert jnp.allclose(lp, lp_kn, rtol=5e-4, atol=1.0), "log_prior mismatch (kernel-numerics ref)"
        assert jnp.allclose(lvp, lvp_kn, rtol=5e-4, atol=1.0), "log_var_post mismatch (kernel-numerics ref)"
        # loose vs the f32 PyTorch-semantics reference (bf16 streams / MXU feed deviate slightly)
        assert jnp.allclose(yy, y_f32, atol=2e-1, rtol=2e-2), "y mismatch (f32 reference)"
        assert jnp.allclose(lp, lp_f32, rtol=2e-3, atol=5.0), "log_prior mismatch (f32 reference)"
        assert jnp.allclose(lvp, lvp_f32, rtol=2e-3, atol=5.0), "log_var_post mismatch (f32 reference)"

    print("KERNEL_OK")
</pallas_src>

<mosaic_0001>
module attributes {stable_mosaic.version = 11 : i64} {
  func.func @_bayes_linear_kernel(%arg0: i32, %arg1: i32, %arg2: i32, %arg3: memref<16x128xbf16, #tpu.memory_space<vmem>>, %arg4: memref<128x128xbf16, #tpu.memory_space<vmem>>, %arg5: memref<128x128xbf16, #tpu.memory_space<vmem>>, %arg6: memref<128x128xbf16, #tpu.memory_space<vmem>>, %arg7: memref<1x128xf32, #tpu.memory_space<vmem>>, %arg8: memref<1x128xf32, #tpu.memory_space<vmem>>, %arg9: memref<1x128xf32, #tpu.memory_space<vmem>>, %arg10: memref<16x128xf32, #tpu.memory_space<vmem>>, %arg11: memref<8x128xf32, #tpu.memory_space<vmem>>, %arg12: memref<8x128xf32, #tpu.memory_space<vmem>>) attributes {dimension_semantics = [#tpu.dimension_semantics<parallel>, #tpu.dimension_semantics<arbitrary>, #tpu.dimension_semantics<arbitrary>], iteration_bounds = array<i64: 2, 2, 2>, scalar_prefetch = 0 : i64, scratch_operands = 0 : i64, tpu.core_type = #tpu.core_type<tc>, window_params = [{transform_indices = @transform_0, window_bounds = array<i64: 16, 128>}, {transform_indices = @transform_1, window_bounds = array<i64: 128, 128>}, {transform_indices = @transform_2, window_bounds = array<i64: 128, 128>}, {transform_indices = @transform_3, window_bounds = array<i64: 128, 128>}, {transform_indices = @transform_4, window_bounds = array<i64: 1, 128>}, {transform_indices = @transform_5, window_bounds = array<i64: 1, 128>}, {transform_indices = @transform_6, window_bounds = array<i64: 1, 128>}, {transform_indices = @transform_7, window_bounds = array<i64: 16, 128>}, {transform_indices = @transform_8, window_bounds = array<i64: 8, 128>}, {transform_indices = @transform_9, window_bounds = array<i64: 8, 128>}]} {
    %c0 = arith.constant 0 : index
    %c0_0 = arith.constant 0 : index
    %0 = vector.load %arg5[%c0, %c0_0] : memref<128x128xbf16, #tpu.memory_space<vmem>>, vector<128x128xbf16>
    %1 = arith.extf %0 : vector<128x128xbf16> to vector<128x128xf32>
    %c0_1 = arith.constant 0 : index
    %c0_2 = arith.constant 0 : index
    %2 = vector.load %arg6[%c0_1, %c0_2] : memref<128x128xbf16, #tpu.memory_space<vmem>>, vector<128x128xbf16>
    %3 = arith.extf %2 : vector<128x128xbf16> to vector<128x128xf32>
    %cst = arith.constant 0.000000e+00 : f32
    %4 = vector.broadcast %cst : f32 to vector<128x128xf32>
    %5 = arith.maximumf %1, %4 : vector<128x128xf32>
    %6 = math.absf %1 : vector<128x128xf32>
    %cst_3 = arith.constant 0.000000e+00 : f32
    %7 = vector.broadcast %cst_3 : f32 to vector<128x128xf32>
    %8 = arith.subf %7, %6 : vector<128x128xf32>
    %9 = math.exp %8 : vector<128x128xf32>
    %cst_4 = arith.constant 1.000000e+00 : f32
    %10 = vector.broadcast %cst_4 : f32 to vector<128x128xf32>
    %11 = arith.addf %10, %9 : vector<128x128xf32>
    %12 = math.log %11 : vector<128x128xf32>
    %13 = arith.addf %5, %12 : vector<128x128xf32>
    %c0_5 = arith.constant 0 : index
    %c0_6 = arith.constant 0 : index
    %14 = vector.load %arg4[%c0_5, %c0_6] : memref<128x128xbf16, #tpu.memory_space<vmem>>, vector<128x128xbf16>
    %15 = arith.extf %14 : vector<128x128xbf16> to vector<128x128xf32>
    %16 = arith.mulf %13, %3 : vector<128x128xf32>
    %17 = arith.addf %15, %16 : vector<128x128xf32>
    %c0_i32 = arith.constant 0 : i32
    %18 = arith.cmpi eq, %arg2, %c0_i32 : i32
    %19 = arith.extui %18 : i1 to i32
    %c0_i32_7 = arith.constant 0 : i32
    %20 = arith.cmpi ne, %19, %c0_i32_7 : i32
    scf.if %20 {
      %c0_20 = arith.constant 0 : index
      %c0_21 = arith.constant 0 : index
      %35 = vector.load %arg8[%c0_20, %c0_21] : memref<1x128xf32, #tpu.memory_space<vmem>>, vector<1x128xf32>
      %cst_22 = arith.constant 0.000000e+00 : f32
      %36 = vector.broadcast %cst_22 : f32 to vector<1x128xf32>
      %37 = arith.maximumf %35, %36 : vector<1x128xf32>
      %38 = math.absf %35 : vector<1x128xf32>
      %cst_23 = arith.constant 0.000000e+00 : f32
      %39 = vector.broadcast %cst_23 : f32 to vector<1x128xf32>
      %40 = arith.subf %39, %38 : vector<1x128xf32>
      %41 = math.exp %40 : vector<1x128xf32>
      %cst_24 = arith.constant 1.000000e+00 : f32
      %42 = vector.broadcast %cst_24 : f32 to vector<1x128xf32>
      %43 = arith.addf %42, %41 : vector<1x128xf32>
      %44 = math.log %43 : vector<1x128xf32>
      %45 = arith.addf %37, %44 : vector<1x128xf32>
      %c0_25 = arith.constant 0 : index
      %c0_26 = arith.constant 0 : index
      %46 = vector.load %arg7[%c0_25, %c0_26] : memref<1x128xf32, #tpu.memory_space<vmem>>, vector<1x128xf32>
      %c0_27 = arith.constant 0 : index
      %c0_28 = arith.constant 0 : index
      %47 = vector.load %arg9[%c0_27, %c0_28] : memref<1x128xf32, #tpu.memory_space<vmem>>, vector<1x128xf32>
      %48 = arith.mulf %45, %47 : vector<1x128xf32>
      %49 = arith.addf %46, %48 : vector<1x128xf32>
      %cst_29 = arith.constant 0.000000e+00 : f32
      %50 = vector.broadcast %cst_29 : f32 to vector<16x128xf32>
      %51 = vector.broadcast %49 : vector<1x128xf32> to vector<16x128xf32>
      %52 = arith.addf %50, %51 : vector<16x128xf32>
      %c0_30 = arith.constant 0 : index
      %c0_31 = arith.constant 0 : index
      %53 = vector.load %arg10[%c0_30, %c0_31] : memref<16x128xf32, #tpu.memory_space<vmem>>, vector<16x128xf32>
      tpu.vector_store %arg10[%c0_30, %c0_31], %52 {strides = array<i32>} : memref<16x128xf32, #tpu.memory_space<vmem>>, vector<16x128xf32>,
      %cst_32 = arith.constant 0.000000e+00 : f32
      %54 = vector.broadcast %cst_32 : f32 to vector<8x128xf32>
      %c0_33 = arith.constant 0 : index
      %c0_34 = arith.constant 0 : index
      %55 = vector.load %arg11[%c0_33, %c0_34] : memref<8x128xf32, #tpu.memory_space<vmem>>, vector<8x128xf32>
      tpu.vector_store %arg11[%c0_33, %c0_34], %54 {strides = array<i32>} : memref<8x128xf32, #tpu.memory_space<vmem>>, vector<8x128xf32>,
      %cst_35 = arith.constant 0.000000e+00 : f32
      %56 = vector.broadcast %cst_35 : f32 to vector<8x128xf32>
      %c0_36 = arith.constant 0 : index
      %c0_37 = arith.constant 0 : index
      %57 = vector.load %arg12[%c0_36, %c0_37] : memref<8x128xf32, #tpu.memory_space<vmem>>, vector<8x128xf32>
      tpu.vector_store %arg12[%c0_36, %c0_37], %56 {strides = array<i32>} : memref<8x128xf32, #tpu.memory_space<vmem>>, vector<8x128xf32>,
    } else {
    }
    %c0_i32_8 = arith.constant 0 : i32
    %21 = arith.cmpi eq, %arg1, %c0_i32_8 : i32
    %c0_i32_9 = arith.constant 0 : i32
    %22 = arith.cmpi eq, %arg2, %c0_i32_9 : i32
    %23 = arith.andi %21, %22 : i1
    %24 = arith.extui %23 : i1 to i32
    %c0_i32_10 = arith.constant 0 : i32
    %25 = arith.cmpi ne, %24, %c0_i32_10 : i32
    scf.if %25 {
      %c0_20 = arith.constant 0 : index
      %c0_21 = arith.constant 0 : index
      %35 = vector.load %arg9[%c0_20, %c0_21] : memref<1x128xf32, #tpu.memory_space<vmem>>, vector<1x128xf32>
      %c0_22 = arith.constant 0 : index
      %c0_23 = arith.constant 0 : index
      %36 = vector.load %arg8[%c0_22, %c0_23] : memref<1x128xf32, #tpu.memory_space<vmem>>, vector<1x128xf32>
      %cst_24 = arith.constant 0.000000e+00 : f32
      %37 = vector.broadcast %cst_24 : f32 to vector<1x128xf32>
      %38 = arith.maximumf %36, %37 : vector<1x128xf32>
      %39 = math.absf %36 : vector<1x128xf32>
      %cst_25 = arith.constant 0.000000e+00 : f32
      %40 = vector.broadcast %cst_25 : f32 to vector<1x128xf32>
      %41 = arith.subf %40, %39 : vector<1x128xf32>
      %42 = math.exp %41 : vector<1x128xf32>
      %cst_26 = arith.constant 1.000000e+00 : f32
      %43 = vector.broadcast %cst_26 : f32 to vector<1x128xf32>
      %44 = arith.addf %43, %42 : vector<1x128xf32>
      %45 = math.log %44 : vector<1x128xf32>
      %46 = arith.addf %38, %45 : vector<1x128xf32>
      %c0_27 = arith.constant 0 : index
      %c0_28 = arith.constant 0 : index
      %47 = vector.load %arg7[%c0_27, %c0_28] : memref<1x128xf32, #tpu.memory_space<vmem>>, vector<1x128xf32>
      %48 = arith.mulf %46, %35 : vector<1x128xf32>
      %49 = arith.addf %47, %48 : vector<1x128xf32>
      %50 = math.log %46 : vector<1x128xf32>
      %51 = arith.mulf %35, %35 : vector<1x128xf32>
      %cst_29 = arith.constant 5.000000e-01 : f32
      %52 = vector.broadcast %cst_29 : f32 to vector<1x128xf32>
      %53 = arith.mulf %52, %51 : vector<1x128xf32>
      %54 = arith.addf %50, %53 : vector<1x128xf32>
      %cst_30 = arith.constant 0.000000e+00 : f32
      %55 = vector.broadcast %cst_30 : f32 to vector<1x128xf32>
      %56 = arith.subf %55, %54 : vector<1x128xf32>
      %57 = arith.mulf %49, %49 : vector<1x128xf32>
      %cst_31 = arith.constant 0.000000e+00 : f32
      %58 = vector.broadcast %cst_31 : f32 to vector<1x128xf32>
      %59 = arith.subf %58, %57 : vector<1x128xf32>
      %cst_32 = arith.constant 5.000000e-01 : f32
      %60 = vector.broadcast %cst_32 : f32 to vector<1x128xf32>
      %61 = arith.mulf %59, %60 : vector<1x128xf32>
      %cst_33 = arith.constant 0.000000e+00 : f32
      %62 = vector.broadcast %cst_33 : f32 to vector<1x128xf32>
      %63 = arith.subf %62, %57 : vector<1x128xf32>
      %cst_34 = arith.constant 81376.8984 : f32
      %64 = vector.broadcast %cst_34 : f32 to vector<1x128xf32>
      %65 = arith.mulf %63, %64 : vector<1x128xf32>
      %66 = math.exp %65 : vector<1x128xf32>
      %cst_35 = arith.constant 201.714401 : f32
      %67 = vector.broadcast %cst_35 : f32 to vector<1x128xf32>
      %68 = arith.mulf %67, %66 : vector<1x128xf32>
      %cst_36 = arith.constant 5.000000e-01 : f32
      %69 = vector.broadcast %cst_36 : f32 to vector<1x128xf32>
      %70 = arith.addf %69, %68 : vector<1x128xf32>
      %71 = math.log %70 : vector<1x128xf32>
      %72 = arith.addf %61, %71 : vector<1x128xf32>
      %c0_37 = arith.constant 0 : index
      %c0_38 = arith.constant 0 : index
      %73 = vector.load %arg12[%c0_37, %c0_38] : memref<8x128xf32, #tpu.memory_space<vmem>>, vector<1x128xf32>
      %74 = arith.addf %73, %56 : vector<1x128xf32>
      %c0_39 = arith.constant 0 : index
      %c0_40 = arith.constant 0 : index
      %75 = vector.load %arg12[%c0_39, %c0_40] : memref<8x128xf32, #tpu.memory_space<vmem>>, vector<1x128xf32>
      tpu.vector_store %arg12[%c0_39, %c0_40], %74 {strides = array<i32>} : memref<8x128xf32, #tpu.memory_space<vmem>>, vector<1x128xf32>,
      %c0_41 = arith.constant 0 : index
      %c0_42 = arith.constant 0 : index
      %76 = vector.load %arg11[%c0_41, %c0_42] : memref<8x128xf32, #tpu.memory_space<vmem>>, vector<1x128xf32>
      %77 = arith.addf %76, %72 : vector<1x128xf32>
      %c0_43 = arith.constant 0 : index
      %c0_44 = arith.constant 0 : index
      %78 = vector.load %arg11[%c0_43, %c0_44] : memref<8x128xf32, #tpu.memory_space<vmem>>, vector<1x128xf32>
      tpu.vector_store %arg11[%c0_43, %c0_44], %77 {strides = array<i32>} : memref<8x128xf32, #tpu.memory_space<vmem>>, vector<1x128xf32>,
    } else {
    }
    %c0_11 = arith.constant 0 : index
    %c0_12 = arith.constant 0 : index
    %26 = vector.load %arg10[%c0_11, %c0_12] : memref<16x128xf32, #tpu.memory_space<vmem>>, vector<16x128xf32>
    %c0_13 = arith.constant 0 : index
    %c0_14 = arith.constant 0 : index
    %27 = vector.load %arg3[%c0_13, %c0_14] : memref<16x128xbf16, #tpu.memory_space<vmem>>, vector<16x128xbf16>
    %28 = arith.truncf %17 : vector<128x128xf32> to vector<128x128xbf16>
    %cst_15 = arith.constant dense<0.000000e+00> : vector<16x128xf32>
    %29 = tpu.matmul %27, %28, %cst_15 {dimension_numbers = #tpu.dot_dimension_numbers<[1], [1], [0], [0], [0, 0, 1, 0], [], []>} : vector<16x128xbf16>, vector<128x128xbf16>, vector<16x128xf32> -> vector<16x128xf32>
    %30 = arith.addf %26, %29 : vector<16x128xf32>
    %c0_16 = arith.constant 0 : index
    %c0_17 = arith.constant 0 : index
    %31 = vector.load %arg10[%c0_16, %c0_17] : memref<16x128xf32, #tpu.memory_space<vmem>>, vector<16x128xf32>
    tpu.vector_store %arg10[%c0_16, %c0_17], %30 {strides = array<i32>} : memref<16x128xf32, #tpu.memory_space<vmem>>, vector<16x128xf32>,
    %c0_i32_18 = arith.constant 0 : i32
    %32 = arith.cmpi eq, %arg1, %c0_i32_18 : i32
    %33 = arith.extui %32 : i1 to i32
    %c0_i32_19 = arith.constant 0 : i32
    %34 = arith.cmpi ne, %33, %c0_i32_19 : i32
    scf.if %34 {
      %cst_20 = arith.constant 0.000000e+00 : f32
      %35 = vector.broadcast %cst_20 : f32 to vector<8x128xf32>
      %cst_21 = arith.constant 0.000000e+00 : f32
      %36 = vector.broadcast %cst_21 : f32 to vector<8x128xf32>
      %37 = vector.extract_strided_slice %13 {offsets = [0, 0], sizes = [8, 128], strides = [1, 1]} : vector<128x128xf32> to vector<8x128xf32>
      %38 = vector.extract_strided_slice %3 {offsets = [0, 0], sizes = [8, 128], strides = [1, 1]} : vector<128x128xf32> to vector<8x128xf32>
      %39 = vector.extract_strided_slice %17 {offsets = [0, 0], sizes = [8, 128], strides = [1, 1]} : vector<128x128xf32> to vector<8x128xf32>
      %40 = math.log %37 : vector<8x128xf32>
      %41 = arith.mulf %38, %38 : vector<8x128xf32>
      %cst_22 = arith.constant 5.000000e-01 : f32
      %42 = vector.broadcast %cst_22 : f32 to vector<8x128xf32>
      %43 = arith.mulf %42, %41 : vector<8x128xf32>
      %44 = arith.addf %40, %43 : vector<8x128xf32>
      %cst_23 = arith.constant 0.000000e+00 : f32
      %45 = vector.broadcast %cst_23 : f32 to vector<8x128xf32>
      %46 = arith.subf %45, %44 : vector<8x128xf32>
      %47 = arith.addf %35, %46 : vector<8x128xf32>
      %48 = arith.mulf %39, %39 : vector<8x128xf32>
      %cst_24 = arith.constant 0.000000e+00 : f32
      %49 = vector.broadcast %cst_24 : f32 to vector<8x128xf32>
      %50 = arith.subf %49, %48 : vector<8x128xf32>
      %cst_25 = arith.constant 5.000000e-01 : f32
      %51 = vector.broadcast %cst_25 : f32 to vector<8x128xf32>
      %52 = arith.mulf %50, %51 : vector<8x128xf32>
      %cst_26 = arith.constant 0.000000e+00 : f32
      %53 = vector.broadcast %cst_26 : f32 to vector<8x128xf32>
      %54 = arith.subf %53, %48 : vector<8x128xf32>
      %cst_27 = arith.constant 81376.8984 : f32
      %55 = vector.broadcast %cst_27 : f32 to vector<8x128xf32>
      %56 = arith.mulf %54, %55 : vector<8x128xf32>
      %57 = math.exp %56 : vector<8x128xf32>
      %cst_28 = arith.constant 201.714401 : f32
      %58 = vector.broadcast %cst_28 : f32 to vector<8x128xf32>
      %59 = arith.mulf %58, %57 : vector<8x128xf32>
      %cst_29 = arith.constant 5.000000e-01 : f32
      %60 = vector.broadcast %cst_29 : f32 to vector<8x128xf32>
      %61 = arith.addf %60, %59 : vector<8x128xf32>
      %62 = math.log %61 : vector<8x128xf32>
      %63 = arith.addf %52, %62 : vector<8x128xf32>
      %64 = arith.addf %36, %63 : vector<8x128xf32>
      %65 = vector.extract_strided_slice %13 {offsets = [8, 0], sizes = [8, 128], strides = [1, 1]} : vector<128x128xf32> to vector<8x128xf32>
      %66 = vector.extract_strided_slice %3 {offsets = [8, 0], sizes = [8, 128], strides = [1, 1]} : vector<128x128xf32> to vector<8x128xf32>
      %67 = vector.extract_strided_slice %17 {offsets = [8, 0], sizes = [8, 128], strides = [1, 1]} : vector<128x128xf32> to vector<8x128xf32>
      %68 = math.log %65 : vector<8x128xf32>
      %69 = arith.mulf %66, %66 : vector<8x128xf32>
      %cst_30 = arith.constant 5.000000e-01 : f32
      %70 = vector.broadcast %cst_30 : f32 to vector<8x128xf32>
      %71 = arith.mulf %70, %69 : vector<8x128xf32>
      %72 = arith.addf %68, %71 : vector<8x128xf32>
      %cst_31 = arith.constant 0.000000e+00 : f32
      %73 = vector.broadcast %cst_31 : f32 to vector<8x128xf32>
      %74 = arith.subf %73, %72 : vector<8x128xf32>
      %75 = arith.addf %47, %74 : vector<8x128xf32>
      %76 = arith.mulf %67, %67 : vector<8x128xf32>
      %cst_32 = arith.constant 0.000000e+00 : f32
      %77 = vector.broadcast %cst_32 : f32 to vector<8x128xf32>
      %78 = arith.subf %77, %76 : vector<8x128xf32>
      %cst_33 = arith.constant 5.000000e-01 : f32
      %79 = vector.broadcast %cst_33 : f32 to vector<8x128xf32>
      %80 = arith.mulf %78, %79 : vector<8x128xf32>
      %cst_34 = arith.constant 0.000000e+00 : f32
      %81 = vector.broadcast %cst_34 : f32 to vector<8x128xf32>
      %82 = arith.subf %81, %76 : vector<8x128xf32>
      %cst_35 = arith.constant 81376.8984 : f32
      %83 = vector.broadcast %cst_35 : f32 to vector<8x128xf32>
      %84 = arith.mulf %82, %83 : vector<8x128xf32>
      %85 = math.exp %84 : vector<8x128xf32>
      %cst_36 = arith.constant 201.714401 : f32
      %86 = vector.broadcast %cst_36 : f32 to vector<8x128xf32>
      %87 = arith.mulf %86, %85 : vector<8x128xf32>
      %cst_37 = arith.constant 5.000000e-01 : f32
      %88 = vector.broadcast %cst_37 : f32 to vector<8x128xf32>
      %89 = arith.addf %88, %87 : vector<8x128xf32>
      %90 = math.log %89 : vector<8x128xf32>
      %91 = arith.addf %80, %90 : vector<8x128xf32>
      %92 = arith.addf %64, %91 : vector<8x128xf32>
      %93 = vector.extract_strided_slice %13 {offsets = [16, 0], sizes = [8, 128], strides = [1, 1]} : vector<128x128xf32> to vector<8x128xf32>
      %94 = vector.extract_strided_slice %3 {offsets = [16, 0], sizes = [8, 128], strides = [1, 1]} : vector<128x128xf32> to vector<8x128xf32>
      %95 = vector.extract_strided_slice %17 {offsets = [16, 0], sizes = [8, 128], strides = [1, 1]} : vector<128x128xf32> to vector<8x128xf32>
      %96 = math.log %93 : vector<8x128xf32>
      %97 = arith.mulf %94, %94 : vector<8x128xf32>
      %cst_38 = arith.constant 5.000000e-01 : f32
      %98 = vector.broadcast %cst_38 : f32 to vector<8x128xf32>
      %99 = arith.mulf %98, %97 : vector<8x128xf32>
      %100 = arith.addf %96, %99 : vector<8x128xf32>
      %cst_39 = arith.constant 0.000000e+00 : f32
      %101 = vector.broadcast %cst_39 : f32 to vector<8x128xf32>
      %102 = arith.subf %101, %100 : vector<8x128xf32>
      %103 = arith.addf %75, %102 : vector<8x128xf32>
      %104 = arith.mulf %95, %95 : vector<8x128xf32>
      %cst_40 = arith.constant 0.000000e+00 : f32
      %105 = vector.broadcast %cst_40 : f32 to vector<8x128xf32>
      %106 = arith.subf %105, %104 : vector<8x128xf32>
      %cst_41 = arith.constant 5.000000e-01 : f32
      %107 = vector.broadcast %cst_41 : f32 to vector<8x128xf32>
      %108 = arith.mulf %106, %107 : vector<8x128xf32>
      %cst_42 = arith.constant 0.000000e+00 : f32
      %109 = vector.broadcast %cst_42 : f32 to vector<8x128xf32>
      %110 = arith.subf %109, %104 : vector<8x128xf32>
      %cst_43 = arith.constant 81376.8984 : f32
      %111 = vector.broadcast %cst_43 : f32 to vector<8x128xf32>
      %112 = arith.mulf %110, %111 : vector<8x128xf32>
      %113 = math.exp %112 : vector<8x128xf32>
      %cst_44 = arith.constant 201.714401 : f32
      %114 = vector.broadcast %cst_44 : f32 to vector<8x128xf32>
      %115 = arith.mulf %114, %113 : vector<8x128xf32>
      %cst_45 = arith.constant 5.000000e-01 : f32
      %116 = vector.broadcast %cst_45 : f32 to vector<8x128xf32>
      %117 = arith.addf %116, %115 : vector<8x128xf32>
      %118 = math.log %117 : vector<8x128xf32>
      %119 = arith.addf %108, %118 : vector<8x128xf32>
      %120 = arith.addf %92, %119 : vector<8x128xf32>
      %121 = vector.extract_strided_slice %13 {offsets = [24, 0], sizes = [8, 128], strides = [1, 1]} : vector<128x128xf32> to vector<8x128xf32>
      %122 = vector.extract_strided_slice %3 {offsets = [24, 0], sizes = [8, 128], strides = [1, 1]} : vector<128x128xf32> to vector<8x128xf32>
      %123 = vector.extract_strided_slice %17 {offsets = [24, 0], sizes = [8, 128], strides = [1, 1]} : vector<128x128xf32> to vector<8x128xf32>
      %124 = math.log %121 : vector<8x128xf32>
      %125 = arith.mulf %122, %122 : vector<8x128xf32>
      %cst_46 = arith.constant 5.000000e-01 : f32
      %126 = vector.broadcast %cst_46 : f32 to vector<8x128xf32>
      %127 = arith.mulf %126, %125 : vector<8x128xf32>
      %128 = arith.addf %124, %127 : vector<8x128xf32>
      %cst_47 = arith.constant 0.000000e+00 : f32
      %129 = vector.broadcast %cst_47 : f32 to vector<8x128xf32>
      %130 = arith.subf %129, %128 : vector<8x128xf32>
      %131 = arith.addf %103, %130 : vector<8x128xf32>
      %132 = arith.mulf %123, %123 : vector<8x128xf32>
      %cst_48 = arith.constant 0.000000e+00 : f32
      %133 = vector.broadcast %cst_48 : f32 to vector<8x128xf32>
      %134 = arith.subf %133, %132 : vector<8x128xf32>
      %cst_49 = arith.constant 5.000000e-01 : f32
      %135 = vector.broadcast %cst_49 : f32 to vector<8x128xf32>
      %136 = arith.mulf %134, %135 : vector<8x128xf32>
      %cst_50 = arith.constant 0.000000e+00 : f32
      %137 = vector.broadcast %cst_50 : f32 to vector<8x128xf32>
      %138 = arith.subf %137, %132 : vector<8x128xf32>
      %cst_51 = arith.constant 81376.8984 : f32
      %139 = vector.broadcast %cst_51 : f32 to vector<8x128xf32>
      %140 = arith.mulf %138, %139 : vector<8x128xf32>
      %141 = math.exp %140 : vector<8x128xf32>
      %cst_52 = arith.constant 201.714401 : f32
      %142 = vector.broadcast %cst_52 : f32 to vector<8x128xf32>
      %143 = arith.mulf %142, %141 : vector<8x128xf32>
      %cst_53 = arith.constant 5.000000e-01 : f32
      %144 = vector.broadcast %cst_53 : f32 to vector<8x128xf32>
      %145 = arith.addf %144, %143 : vector<8x128xf32>
      %146 = math.log %145 : vector<8x128xf32>
      %147 = arith.addf %136, %146 : vector<8x128xf32>
      %148 = arith.addf %120, %147 : vector<8x128xf32>
      %149 = vector.extract_strided_slice %13 {offsets = [32, 0], sizes = [8, 128], strides = [1, 1]} : vector<128x128xf32> to vector<8x128xf32>
      %150 = vector.extract_strided_slice %3 {offsets = [32, 0], sizes = [8, 128], strides = [1, 1]} : vector<128x128xf32> to vector<8x128xf32>
      %151 = vector.extract_strided_slice %17 {offsets = [32, 0], sizes = [8, 128], strides = [1, 1]} : vector<128x128xf32> to vector<8x128xf32>
      %152 = math.log %149 : vector<8x128xf32>
      %153 = arith.mulf %150, %150 : vector<8x128xf32>
      %cst_54 = arith.constant 5.000000e-01 : f32
      %154 = vector.broadcast %cst_54 : f32 to vector<8x128xf32>
      %155 = arith.mulf %154, %153 : vector<8x128xf32>
      %156 = arith.addf %152, %155 : vector<8x128xf32>
      %cst_55 = arith.constant 0.000000e+00 : f32
      %157 = vector.broadcast %cst_55 : f32 to vector<8x128xf32>
      %158 = arith.subf %157, %156 : vector<8x128xf32>
      %159 = arith.addf %131, %158 : vector<8x128xf32>
      %160 = arith.mulf %151, %151 : vector<8x128xf32>
      %cst_56 = arith.constant 0.000000e+00 : f32
      %161 = vector.broadcast %cst_56 : f32 to vector<8x128xf32>
      %162 = arith.subf %161, %160 : vector<8x128xf32>
      %cst_57 = arith.constant 5.000000e-01 : f32
      %163 = vector.broadcast %cst_57 : f32 to vector<8x128xf32>
      %164 = arith.mulf %162, %163 : vector<8x128xf32>
      %cst_58 = arith.constant 0.000000e+00 : f32
      %165 = vector.broadcast %cst_58 : f32 to vector<8x128xf32>
      %166 = arith.subf %165, %160 : vector<8x128xf32>
      %cst_59 = arith.constant 81376.8984 : f32
      %167 = vector.broadcast %cst_59 : f32 to vector<8x128xf32>
      %168 = arith.mulf %166, %167 : vector<8x128xf32>
      %169 = math.exp %168 : vector<8x128xf32>
      %cst_60 = arith.constant 201.714401 : f32
      %170 = vector.broadcast %cst_60 : f32 to vector<8x128xf32>
      %171 = arith.mulf %170, %169 : vector<8x128xf32>
      %cst_61 = arith.constant 5.000000e-01 : f32
      %172 = vector.broadcast %cst_61 : f32 to vector<8x128xf32>
      %173 = arith.addf %172, %171 : vector<8x128xf32>
      %174 = math.log %173 : vector<8x128xf32>
      %175 = arith.addf %164, %174 : vector<8x128xf32>
      %176 = arith.addf %148, %175 : vector<8x128xf32>
      %177 = vector.extract_strided_slice %13 {offsets = [40, 0], sizes = [8, 128], strides = [1, 1]} : vector<128x128xf32> to vector<8x128xf32>
      %178 = vector.extract_strided_slice %3 {offsets = [40, 0], sizes = [8, 128], strides = [1, 1]} : vector<128x128xf32> to vector<8x128xf32>
      %179 = vector.extract_strided_slice %17 {offsets = [40, 0], sizes = [8, 128], strides = [1, 1]} : vector<128x128xf32> to vector<8x128xf32>
      %180 = math.log %177 : vector<8x128xf32>
      %181 = arith.mulf %178, %178 : vector<8x128xf32>
      %cst_62 = arith.constant 5.000000e-01 : f32
      %182 = vector.broadcast %cst_62 : f32 to vector<8x128xf32>
      %183 = arith.mulf %182, %181 : vector<8x128xf32>
      %184 = arith.addf %180, %183 : vector<8x128xf32>
      %cst_63 = arith.constant 0.000000e+00 : f32
      %185 = vector.broadcast %cst_63 : f32 to vector<8x128xf32>
      %186 = arith.subf %185, %184 : vector<8x128xf32>
      %187 = arith.addf %159, %186 : vector<8x128xf32>
      %188 = arith.mulf %179, %179 : vector<8x128xf32>
      %cst_64 = arith.constant 0.000000e+00 : f32
      %189 = vector.broadcast %cst_64 : f32 to vector<8x128xf32>
      %190 = arith.subf %189, %188 : vector<8x128xf32>
      %cst_65 = arith.constant 5.000000e-01 : f32
      %191 = vector.broadcast %cst_65 : f32 to vector<8x128xf32>
      %192 = arith.mulf %190, %191 : vector<8x128xf32>
      %cst_66 = arith.constant 0.000000e+00 : f32
      %193 = vector.broadcast %cst_66 : f32 to vector<8x128xf32>
      %194 = arith.subf %193, %188 : vector<8x128xf32>
      %cst_67 = arith.constant 81376.8984 : f32
      %195 = vector.broadcast %cst_67 : f32 to vector<8x128xf32>
      %196 = arith.mulf %194, %195 : vector<8x128xf32>
      %197 = math.exp %196 : vector<8x128xf32>
      %cst_68 = arith.constant 201.714401 : f32
      %198 = vector.broadcast %cst_68 : f32 to vector<8x128xf32>
      %199 = arith.mulf %198, %197 : vector<8x128xf32>
      %cst_69 = arith.constant 5.000000e-01 : f32
      %200 = vector.broadcast %cst_69 : f32 to vector<8x128xf32>
      %201 = arith.addf %200, %199 : vector<8x128xf32>
      %202 = math.log %201 : vector<8x128xf32>
      %203 = arith.addf %192, %202 : vector<8x128xf32>
      %204 = arith.addf %176, %203 : vector<8x128xf32>
      %205 = vector.extract_strided_slice %13 {offsets = [48, 0], sizes = [8, 128], strides = [1, 1]} : vector<128x128xf32> to vector<8x128xf32>
      %206 = vector.extract_strided_slice %3 {offsets = [48, 0], sizes = [8, 128], strides = [1, 1]} : vector<128x128xf32> to vector<8x128xf32>
      %207 = vector.extract_strided_slice %17 {offsets = [48, 0], sizes = [8, 128], strides = [1, 1]} : vector<128x128xf32> to vector<8x128xf32>
      %208 = math.log %205 : vector<8x128xf32>
      %209 = arith.mulf %206, %206 : vector<8x128xf32>
      %cst_70 = arith.constant 5.000000e-01 : f32
      %210 = vector.broadcast %cst_70 : f32 to vector<8x128xf32>
      %211 = arith.mulf %210, %209 : vector<8x128xf32>
      %212 = arith.addf %208, %211 : vector<8x128xf32>
      %cst_71 = arith.constant 0.000000e+00 : f32
      %213 = vector.broadcast %cst_71 : f32 to vector<8x128xf32>
      %214 = arith.subf %213, %212 : vector<8x128xf32>
      %215 = arith.addf %187, %214 : vector<8x128xf32>
      %216 = arith.mulf %207, %207 : vector<8x128xf32>
      %cst_72 = arith.constant 0.000000e+00 : f32
      %217 = vector.broadcast %cst_72 : f32 to vector<8x128xf32>
      %218 = arith.subf %217, %216 : vector<8x128xf32>
      %cst_73 = arith.constant 5.000000e-01 : f32
      %219 = vector.broadcast %cst_73 : f32 to vector<8x128xf32>
      %220 = arith.mulf %218, %219 : vector<8x128xf32>
      %cst_74 = arith.constant 0.000000e+00 : f32
      %221 = vector.broadcast %cst_74 : f32 to vector<8x128xf32>
      %222 = arith.subf %221, %216 : vector<8x128xf32>
      %cst_75 = arith.constant 81376.8984 : f32
      %223 = vector.broadcast %cst_75 : f32 to vector<8x128xf32>
      %224 = arith.mulf %222, %223 : vector<8x128xf32>
      %225 = math.exp %224 : vector<8x128xf32>
      %cst_76 = arith.constant 201.714401 : f32
      %226 = vector.broadcast %cst_76 : f32 to vector<8x128xf32>
      %227 = arith.mulf %226, %225 : vector<8x128xf32>
      %cst_77 = arith.constant 5.000000e-01 : f32
      %228 = vector.broadcast %cst_77 : f32 to vector<8x128xf32>
      %229 = arith.addf %228, %227 : vector<8x128xf32>
      %230 = math.log %229 : vector<8x128xf32>
      %231 = arith.addf %220, %230 : vector<8x128xf32>
      %232 = arith.addf %204, %231 : vector<8x128xf32>
      %233 = vector.extract_strided_slice %13 {offsets = [56, 0], sizes = [8, 128], strides = [1, 1]} : vector<128x128xf32> to vector<8x128xf32>
      %234 = vector.extract_strided_slice %3 {offsets = [56, 0], sizes = [8, 128], strides = [1, 1]} : vector<128x128xf32> to vector<8x128xf32>
      %235 = vector.extract_strided_slice %17 {offsets = [56, 0], sizes = [8, 128], strides = [1, 1]} : vector<128x128xf32> to vector<8x128xf32>
      %236 = math.log %233 : vector<8x128xf32>
      %237 = arith.mulf %234, %234 : vector<8x128xf32>
      %cst_78 = arith.constant 5.000000e-01 : f32
      %238 = vector.broadcast %cst_78 : f32 to vector<8x128xf32>
      %239 = arith.mulf %238, %237 : vector<8x128xf32>
      %240 = arith.addf %236, %239 : vector<8x128xf32>
      %cst_79 = arith.constant 0.000000e+00 : f32
      %241 = vector.broadcast %cst_79 : f32 to vector<8x128xf32>
      %242 = arith.subf %241, %240 : vector<8x128xf32>
      %243 = arith.addf %215, %242 : vector<8x128xf32>
      %244 = arith.mulf %235, %235 : vector<8x128xf32>
      %cst_80 = arith.constant 0.000000e+00 : f32
      %245 = vector.broadcast %cst_80 : f32 to vector<8x128xf32>
      %246 = arith.subf %245, %244 : vector<8x128xf32>
      %cst_81 = arith.constant 5.000000e-01 : f32
      %247 = vector.broadcast %cst_81 : f32 to vector<8x128xf32>
      %248 = arith.mulf %246, %247 : vector<8x128xf32>
      %cst_82 = arith.constant 0.000000e+00 : f32
      %249 = vector.broadcast %cst_82 : f32 to vector<8x128xf32>
      %250 = arith.subf %249, %244 : vector<8x128xf32>
      %cst_83 = arith.constant 81376.8984 : f32
      %251 = vector.broadcast %cst_83 : f32 to vector<8x128xf32>
      %252 = arith.mulf %250, %251 : vector<8x128xf32>
      %253 = math.exp %252 : vector<8x128xf32>
      %cst_84 = arith.constant 201.714401 : f32
      %254 = vector.broadcast %cst_84 : f32 to vector<8x128xf32>
      %255 = arith.mulf %254, %253 : vector<8x128xf32>
      %cst_85 = arith.constant 5.000000e-01 : f32
      %256 = vector.broadcast %cst_85 : f32 to vector<8x128xf32>
      %257 = arith.addf %256, %255 : vector<8x128xf32>
      %258 = math.log %257 : vector<8x128xf32>
      %259 = arith.addf %248, %258 : vector<8x128xf32>
      %260 = arith.addf %232, %259 : vector<8x128xf32>
      %261 = vector.extract_strided_slice %13 {offsets = [64, 0], sizes = [8, 128], strides = [1, 1]} : vector<128x128xf32> to vector<8x128xf32>
      %262 = vector.extract_strided_slice %3 {offsets = [64, 0], sizes = [8, 128], strides = [1, 1]} : vector<128x128xf32> to vector<8x128xf32>
      %263 = vector.extract_strided_slice %17 {offsets = [64, 0], sizes = [8, 128], strides = [1, 1]} : vector<128x128xf32> to vector<8x128xf32>
      %264 = math.log %261 : vector<8x128xf32>
      %265 = arith.mulf %262, %262 : vector<8x128xf32>
      %cst_86 = arith.constant 5.000000e-01 : f32
      %266 = vector.broadcast %cst_86 : f32 to vector<8x128xf32>
      %267 = arith.mulf %266, %265 : vector<8x128xf32>
      %268 = arith.addf %264, %267 : vector<8x128xf32>
      %cst_87 = arith.constant 0.000000e+00 : f32
      %269 = vector.broadcast %cst_87 : f32 to vector<8x128xf32>
      %270 = arith.subf %269, %268 : vector<8x128xf32>
      %271 = arith.addf %243, %270 : vector<8x128xf32>
      %272 = arith.mulf %263, %263 : vector<8x128xf32>
      %cst_88 = arith.constant 0.000000e+00 : f32
      %273 = vector.broadcast %cst_88 : f32 to vector<8x128xf32>
      %274 = arith.subf %273, %272 : vector<8x128xf32>
      %cst_89 = arith.constant 5.000000e-01 : f32
      %275 = vector.broadcast %cst_89 : f32 to vector<8x128xf32>
      %276 = arith.mulf %274, %275 : vector<8x128xf32>
      %cst_90 = arith.constant 0.000000e+00 : f32
      %277 = vector.broadcast %cst_90 : f32 to vector<8x128xf32>
      %278 = arith.subf %277, %272 : vector<8x128xf32>
      %cst_91 = arith.constant 81376.8984 : f32
      %279 = vector.broadcast %cst_91 : f32 to vector<8x128xf32>
      %280 = arith.mulf %278, %279 : vector<8x128xf32>
      %281 = math.exp %280 : vector<8x128xf32>
      %cst_92 = arith.constant 201.714401 : f32
      %282 = vector.broadcast %cst_92 : f32 to vector<8x128xf32>
      %283 = arith.mulf %282, %281 : vector<8x128xf32>
      %cst_93 = arith.constant 5.000000e-01 : f32
      %284 = vector.broadcast %cst_93 : f32 to vector<8x128xf32>
      %285 = arith.addf %284, %283 : vector<8x128xf32>
      %286 = math.log %285 : vector<8x128xf32>
      %287 = arith.addf %276, %286 : vector<8x128xf32>
      %288 = arith.addf %260, %287 : vector<8x128xf32>
      %289 = vector.extract_strided_slice %13 {offsets = [72, 0], sizes = [8, 128], strides = [1, 1]} : vector<128x128xf32> to vector<8x128xf32>
      %290 = vector.extract_strided_slice %3 {offsets = [72, 0], sizes = [8, 128], strides = [1, 1]} : vector<128x128xf32> to vector<8x128xf32>
      %291 = vector.extract_strided_slice %17 {offsets = [72, 0], sizes = [8, 128], strides = [1, 1]} : vector<128x128xf32> to vector<8x128xf32>
      %292 = math.log %289 : vector<8x128xf32>
      %293 = arith.mulf %290, %290 : vector<8x128xf32>
      %cst_94 = arith.constant 5.000000e-01 : f32
      %294 = vector.broadcast %cst_94 : f32 to vector<8x128xf32>
      %295 = arith.mulf %294, %293 : vector<8x128xf32>
      %296 = arith.addf %292, %295 : vector<8x128xf32>
      %cst_95 = arith.constant 0.000000e+00 : f32
      %297 = vector.broadcast %cst_95 : f32 to vector<8x128xf32>
      %298 = arith.subf %297, %296 : vector<8x128xf32>
      %299 = arith.addf %271, %298 : vector<8x128xf32>
      %300 = arith.mulf %291, %291 : vector<8x128xf32>
      %cst_96 = arith.constant 0.000000e+00 : f32
      %301 = vector.broadcast %cst_96 : f32 to vector<8x128xf32>
      %302 = arith.subf %301, %300 : vector<8x128xf32>
      %cst_97 = arith.constant 5.000000e-01 : f32
      %303 = vector.broadcast %cst_97 : f32 to vector<8x128xf32>
      %304 = arith.mulf %302, %303 : vector<8x128xf32>
      %cst_98 = arith.constant 0.000000e+00 : f32
      %305 = vector.broadcast %cst_98 : f32 to vector<8x128xf32>
      %306 = arith.subf %305, %300 : vector<8x128xf32>
      %cst_99 = arith.constant 81376.8984 : f32
      %307 = vector.broadcast %cst_99 : f32 to vector<8x128xf32>
      %308 = arith.mulf %306, %307 : vector<8x128xf32>
      %309 = math.exp %308 : vector<8x128xf32>
      %cst_100 = arith.constant 201.714401 : f32
      %310 = vector.broadcast %cst_100 : f32 to vector<8x128xf32>
      %311 = arith.mulf %310, %309 : vector<8x128xf32>
      %cst_101 = arith.constant 5.000000e-01 : f32
      %312 = vector.broadcast %cst_101 : f32 to vector<8x128xf32>
      %313 = arith.addf %312, %311 : vector<8x128xf32>
      %314 = math.log %313 : vector<8x128xf32>
      %315 = arith.addf %304, %314 : vector<8x128xf32>
      %316 = arith.addf %288, %315 : vector<8x128xf32>
      %317 = vector.extract_strided_slice %13 {offsets = [80, 0], sizes = [8, 128], strides = [1, 1]} : vector<128x128xf32> to vector<8x128xf32>
      %318 = vector.extract_strided_slice %3 {offsets = [80, 0], sizes = [8, 128], strides = [1, 1]} : vector<128x128xf32> to vector<8x128xf32>
      %319 = vector.extract_strided_slice %17 {offsets = [80, 0], sizes = [8, 128], strides = [1, 1]} : vector<128x128xf32> to vector<8x128xf32>
      %320 = math.log %317 : vector<8x128xf32>
      %321 = arith.mulf %318, %318 : vector<8x128xf32>
      %cst_102 = arith.constant 5.000000e-01 : f32
      %322 = vector.broadcast %cst_102 : f32 to vector<8x128xf32>
      %323 = arith.mulf %322, %321 : vector<8x128xf32>
      %324 = arith.addf %320, %323 : vector<8x128xf32>
      %cst_103 = arith.constant 0.000000e+00 : f32
      %325 = vector.broadcast %cst_103 : f32 to vector<8x128xf32>
      %326 = arith.subf %325, %324 : vector<8x128xf32>
      %327 = arith.addf %299, %326 : vector<8x128xf32>
      %328 = arith.mulf %319, %319 : vector<8x128xf32>
      %cst_104 = arith.constant 0.000000e+00 : f32
      %329 = vector.broadcast %cst_104 : f32 to vector<8x128xf32>
      %330 = arith.subf %329, %328 : vector<8x128xf32>
      %cst_105 = arith.constant 5.000000e-01 : f32
      %331 = vector.broadcast %cst_105 : f32 to vector<8x128xf32>
      %332 = arith.mulf %330, %331 : vector<8x128xf32>
      %cst_106 = arith.constant 0.000000e+00 : f32
      %333 = vector.broadcast %cst_106 : f32 to vector<8x128xf32>
      %334 = arith.subf %333, %328 : vector<8x128xf32>
      %cst_107 = arith.constant 81376.8984 : f32
      %335 = vector.broadcast %cst_107 : f32 to vector<8x128xf32>
      %336 = arith.mulf %334, %335 : vector<8x128xf32>
      %337 = math.exp %336 : vector<8x128xf32>
      %cst_108 = arith.constant 201.714401 : f32
      %338 = vector.broadcast %cst_108 : f32 to vector<8x128xf32>
      %339 = arith.mulf %338, %337 : vector<8x128xf32>
      %cst_109 = arith.constant 5.000000e-01 : f32
      %340 = vector.broadcast %cst_109 : f32 to vector<8x128xf32>
      %341 = arith.addf %340, %339 : vector<8x128xf32>
      %342 = math.log %341 : vector<8x128xf32>
      %343 = arith.addf %332, %342 : vector<8x128xf32>
      %344 = arith.addf %316, %343 : vector<8x128xf32>
      %345 = vector.extract_strided_slice %13 {offsets = [88, 0], sizes = [8, 128], strides = [1, 1]} : vector<128x128xf32> to vector<8x128xf32>
      %346 = vector.extract_strided_slice %3 {offsets = [88, 0], sizes = [8, 128], strides = [1, 1]} : vector<128x128xf32> to vector<8x128xf32>
      %347 = vector.extract_strided_slice %17 {offsets = [88, 0], sizes = [8, 128], strides = [1, 1]} : vector<128x128xf32> to vector<8x128xf32>
      %348 = math.log %345 : vector<8x128xf32>
      %349 = arith.mulf %346, %346 : vector<8x128xf32>
      %cst_110 = arith.constant 5.000000e-01 : f32
      %350 = vector.broadcast %cst_110 : f32 to vector<8x128xf32>
      %351 = arith.mulf %350, %349 : vector<8x128xf32>
      %352 = arith.addf %348, %351 : vector<8x128xf32>
      %cst_111 = arith.constant 0.000000e+00 : f32
      %353 = vector.broadcast %cst_111 : f32 to vector<8x128xf32>
      %354 = arith.subf %353, %352 : vector<8x128xf32>
      %355 = arith.addf %327, %354 : vector<8x128xf32>
      %356 = arith.mulf %347, %347 : vector<8x128xf32>
      %cst_112 = arith.constant 0.000000e+00 : f32
      %357 = vector.broadcast %cst_112 : f32 to vector<8x128xf32>
      %358 = arith.subf %357, %356 : vector<8x128xf32>
      %cst_113 = arith.constant 5.000000e-01 : f32
      %359 = vector.broadcast %cst_113 : f32 to vector<8x128xf32>
      %360 = arith.mulf %358, %359 : vector<8x128xf32>
      %cst_114 = arith.constant 0.000000e+00 : f32
      %361 = vector.broadcast %cst_114 : f32 to vector<8x128xf32>
      %362 = arith.subf %361, %356 : vector<8x128xf32>
      %cst_115 = arith.constant 81376.8984 : f32
      %363 = vector.broadcast %cst_115 : f32 to vector<8x128xf32>
      %364 = arith.mulf %362, %363 : vector<8x128xf32>
      %365 = math.exp %364 : vector<8x128xf32>
      %cst_116 = arith.constant 201.714401 : f32
      %366 = vector.broadcast %cst_116 : f32 to vector<8x128xf32>
      %367 = arith.mulf %366, %365 : vector<8x128xf32>
      %cst_117 = arith.constant 5.000000e-01 : f32
      %368 = vector.broadcast %cst_117 : f32 to vector<8x128xf32>
      %369 = arith.addf %368, %367 : vector<8x128xf32>
      %370 = math.log %369 : vector<8x128xf32>
      %371 = arith.addf %360, %370 : vector<8x128xf32>
      %372 = arith.addf %344, %371 : vector<8x128xf32>
      %373 = vector.extract_strided_slice %13 {offsets = [96, 0], sizes = [8, 128], strides = [1, 1]} : vector<128x128xf32> to vector<8x128xf32>
      %374 = vector.extract_strided_slice %3 {offsets = [96, 0], sizes = [8, 128], strides = [1, 1]} : vector<128x128xf32> to vector<8x128xf32>
      %375 = vector.extract_strided_slice %17 {offsets = [96, 0], sizes = [8, 128], strides = [1, 1]} : vector<128x128xf32> to vector<8x128xf32>
      %376 = math.log %373 : vector<8x128xf32>
      %377 = arith.mulf %374, %374 : vector<8x128xf32>
      %cst_118 = arith.constant 5.000000e-01 : f32
      %378 = vector.broadcast %cst_118 : f32 to vector<8x128xf32>
      %379 = arith.mulf %378, %377 : vector<8x128xf32>
      %380 = arith.addf %376, %379 : vector<8x128xf32>
      %cst_119 = arith.constant 0.000000e+00 : f32
      %381 = vector.broadcast %cst_119 : f32 to vector<8x128xf32>
      %382 = arith.subf %381, %380 : vector<8x128xf32>
      %383 = arith.addf %355, %382 : vector<8x128xf32>
      %384 = arith.mulf %375, %375 : vector<8x128xf32>
      %cst_120 = arith.constant 0.000000e+00 : f32
      %385 = vector.broadcast %cst_120 : f32 to vector<8x128xf32>
      %386 = arith.subf %385, %384 : vector<8x128xf32>
      %cst_121 = arith.constant 5.000000e-01 : f32
      %387 = vector.broadcast %cst_121 : f32 to vector<8x128xf32>
      %388 = arith.mulf %386, %387 : vector<8x128xf32>
      %cst_122 = arith.constant 0.000000e+00 : f32
      %389 = vector.broadcast %cst_122 : f32 to vector<8x128xf32>
      %390 = arith.subf %389, %384 : vector<8x128xf32>
      %cst_123 = arith.constant 81376.8984 : f32
      %391 = vector.broadcast %cst_123 : f32 to vector<8x128xf32>
      %392 = arith.mulf %390, %391 : vector<8x128xf32>
      %393 = math.exp %392 : vector<8x128xf32>
      %cst_124 = arith.constant 201.714401 : f32
      %394 = vector.broadcast %cst_124 : f32 to vector<8x128xf32>
      %395 = arith.mulf %394, %393 : vector<8x128xf32>
      %cst_125 = arith.constant 5.000000e-01 : f32
      %396 = vector.broadcast %cst_125 : f32 to vector<8x128xf32>
      %397 = arith.addf %396, %395 : vector<8x128xf32>
      %398 = math.log %397 : vector<8x128xf32>
      %399 = arith.addf %388, %398 : vector<8x128xf32>
      %400 = arith.addf %372, %399 : vector<8x128xf32>
      %401 = vector.extract_strided_slice %13 {offsets = [104, 0], sizes = [8, 128], strides = [1, 1]} : vector<128x128xf32> to vector<8x128xf32>
      %402 = vector.extract_strided_slice %3 {offsets = [104, 0], sizes = [8, 128], strides = [1, 1]} : vector<128x128xf32> to vector<8x128xf32>
      %403 = vector.extract_strided_slice %17 {offsets = [104, 0], sizes = [8, 128], strides = [1, 1]} : vector<128x128xf32> to vector<8x128xf32>
      %404 = math.log %401 : vector<8x128xf32>
      %405 = arith.mulf %402, %402 : vector<8x128xf32>
      %cst_126 = arith.constant 5.000000e-01 : f32
      %406 = vector.broadcast %cst_126 : f32 to vector<8x128xf32>
      %407 = arith.mulf %406, %405 : vector<8x128xf32>
      %408 = arith.addf %404, %407 : vector<8x128xf32>
      %cst_127 = arith.constant 0.000000e+00 : f32
      %409 = vector.broadcast %cst_127 : f32 to vector<8x128xf32>
      %410 = arith.subf %409, %408 : vector<8x128xf32>
      %411 = arith.addf %383, %410 : vector<8x128xf32>
      %412 = arith.mulf %403, %403 : vector<8x128xf32>
      %cst_128 = arith.constant 0.000000e+00 : f32
      %413 = vector.broadcast %cst_128 : f32 to vector<8x128xf32>
      %414 = arith.subf %413, %412 : vector<8x128xf32>
      %cst_129 = arith.constant 5.000000e-01 : f32
      %415 = vector.broadcast %cst_129 : f32 to vector<8x128xf32>
      %416 = arith.mulf %414, %415 : vector<8x128xf32>
      %cst_130 = arith.constant 0.000000e+00 : f32
      %417 = vector.broadcast %cst_130 : f32 to vector<8x128xf32>
      %418 = arith.subf %417, %412 : vector<8x128xf32>
      %cst_131 = arith.constant 81376.8984 : f32
      %419 = vector.broadcast %cst_131 : f32 to vector<8x128xf32>
      %420 = arith.mulf %418, %419 : vector<8x128xf32>
      %421 = math.exp %420 : vector<8x128xf32>
      %cst_132 = arith.constant 201.714401 : f32
      %422 = vector.broadcast %cst_132 : f32 to vector<8x128xf32>
      %423 = arith.mulf %422, %421 : vector<8x128xf32>
      %cst_133 = arith.constant 5.000000e-01 : f32
      %424 = vector.broadcast %cst_133 : f32 to vector<8x128xf32>
      %425 = arith.addf %424, %423 : vector<8x128xf32>
      %426 = math.log %425 : vector<8x128xf32>
      %427 = arith.addf %416, %426 : vector<8x128xf32>
      %428 = arith.addf %400, %427 : vector<8x128xf32>
      %429 = vector.extract_strided_slice %13 {offsets = [112, 0], sizes = [8, 128], strides = [1, 1]} : vector<128x128xf32> to vector<8x128xf32>
      %430 = vector.extract_strided_slice %3 {offsets = [112, 0], sizes = [8, 128], strides = [1, 1]} : vector<128x128xf32> to vector<8x128xf32>
      %431 = vector.extract_strided_slice %17 {offsets = [112, 0], sizes = [8, 128], strides = [1, 1]} : vector<128x128xf32> to vector<8x128xf32>
      %432 = math.log %429 : vector<8x128xf32>
      %433 = arith.mulf %430, %430 : vector<8x128xf32>
      %cst_134 = arith.constant 5.000000e-01 : f32
      %434 = vector.broadcast %cst_134 : f32 to vector<8x128xf32>
      %435 = arith.mulf %434, %433 : vector<8x128xf32>
      %436 = arith.addf %432, %435 : vector<8x128xf32>
      %cst_135 = arith.constant 0.000000e+00 : f32
      %437 = vector.broadcast %cst_135 : f32 to vector<8x128xf32>
      %438 = arith.subf %437, %436 : vector<8x128xf32>
      %439 = arith.addf %411, %438 : vector<8x128xf32>
      %440 = arith.mulf %431, %431 : vector<8x128xf32>
      %cst_136 = arith.constant 0.000000e+00 : f32
      %441 = vector.broadcast %cst_136 : f32 to vector<8x128xf32>
      %442 = arith.subf %441, %440 : vector<8x128xf32>
      %cst_137 = arith.constant 5.000000e-01 : f32
      %443 = vector.broadcast %cst_137 : f32 to vector<8x128xf32>
      %444 = arith.mulf %442, %443 : vector<8x128xf32>
      %cst_138 = arith.constant 0.000000e+00 : f32
      %445 = vector.broadcast %cst_138 : f32 to vector<8x128xf32>
      %446 = arith.subf %445, %440 : vector<8x128xf32>
      %cst_139 = arith.constant 81376.8984 : f32
      %447 = vector.broadcast %cst_139 : f32 to vector<8x128xf32>
      %448 = arith.mulf %446, %447 : vector<8x128xf32>
      %449 = math.exp %448 : vector<8x128xf32>
      %cst_140 = arith.constant 201.714401 : f32
      %450 = vector.broadcast %cst_140 : f32 to vector<8x128xf32>
      %451 = arith.mulf %450, %449 : vector<8x128xf32>
      %cst_141 = arith.constant 5.000000e-01 : f32
      %452 = vector.broadcast %cst_141 : f32 to vector<8x128xf32>
      %453 = arith.addf %452, %451 : vector<8x128xf32>
      %454 = math.log %453 : vector<8x128xf32>
      %455 = arith.addf %444, %454 : vector<8x128xf32>
      %456 = arith.addf %428, %455 : vector<8x128xf32>
      %457 = vector.extract_strided_slice %13 {offsets = [120, 0], sizes = [8, 128], strides = [1, 1]} : vector<128x128xf32> to vector<8x128xf32>
      %458 = vector.extract_strided_slice %3 {offsets = [120, 0], sizes = [8, 128], strides = [1, 1]} : vector<128x128xf32> to vector<8x128xf32>
      %459 = vector.extract_strided_slice %17 {offsets = [120, 0], sizes = [8, 128], strides = [1, 1]} : vector<128x128xf32> to vector<8x128xf32>
      %460 = math.log %457 : vector<8x128xf32>
      %461 = arith.mulf %458, %458 : vector<8x128xf32>
      %cst_142 = arith.constant 5.000000e-01 : f32
      %462 = vector.broadcast %cst_142 : f32 to vector<8x128xf32>
      %463 = arith.mulf %462, %461 : vector<8x128xf32>
      %464 = arith.addf %460, %463 : vector<8x128xf32>
      %cst_143 = arith.constant 0.000000e+00 : f32
      %465 = vector.broadcast %cst_143 : f32 to vector<8x128xf32>
      %466 = arith.subf %465, %464 : vector<8x128xf32>
      %467 = arith.addf %439, %466 : vector<8x128xf32>
      %468 = arith.mulf %459, %459 : vector<8x128xf32>
      %cst_144 = arith.constant 0.000000e+00 : f32
      %469 = vector.broadcast %cst_144 : f32 to vector<8x128xf32>
      %470 = arith.subf %469, %468 : vector<8x128xf32>
      %cst_145 = arith.constant 5.000000e-01 : f32
      %471 = vector.broadcast %cst_145 : f32 to vector<8x128xf32>
      %472 = arith.mulf %470, %471 : vector<8x128xf32>
      %cst_146 = arith.constant 0.000000e+00 : f32
      %473 = vector.broadcast %cst_146 : f32 to vector<8x128xf32>
      %474 = arith.subf %473, %468 : vector<8x128xf32>
      %cst_147 = arith.constant 81376.8984 : f32
      %475 = vector.broadcast %cst_147 : f32 to vector<8x128xf32>
      %476 = arith.mulf %474, %475 : vector<8x128xf32>
      %477 = math.exp %476 : vector<8x128xf32>
      %cst_148 = arith.constant 201.714401 : f32
      %478 = vector.broadcast %cst_148 : f32 to vector<8x128xf32>
      %479 = arith.mulf %478, %477 : vector<8x128xf32>
      %cst_149 = arith.constant 5.000000e-01 : f32
      %480 = vector.broadcast %cst_149 : f32 to vector<8x128xf32>
      %481 = arith.addf %480, %479 : vector<8x128xf32>
      %482 = math.log %481 : vector<8x128xf32>
      %483 = arith.addf %472, %482 : vector<8x128xf32>
      %484 = arith.addf %456, %483 : vector<8x128xf32>
      %c0_150 = arith.constant 0 : index
      %c0_151 = arith.constant 0 : index
      %485 = vector.load %arg12[%c0_150, %c0_151] : memref<8x128xf32, #tpu.memory_space<vmem>>, vector<8x128xf32>
      %486 = arith.addf %485, %467 : vector<8x128xf32>
      %c0_152 = arith.constant 0 : index
      %c0_153 = arith.constant 0 : index
      %487 = vector.load %arg12[%c0_152, %c0_153] : memref<8x128xf32, #tpu.memory_space<vmem>>, vector<8x128xf32>
      tpu.vector_store %arg12[%c0_152, %c0_153], %486 {strides = array<i32>} : memref<8x128xf32, #tpu.memory_space<vmem>>, vector<8x128xf32>,
      %c0_154 = arith.constant 0 : index
      %c0_155 = arith.constant 0 : index
      %488 = vector.load %arg11[%c0_154, %c0_155] : memref<8x128xf32, #tpu.memory_space<vmem>>, vector<8x128xf32>
      %489 = arith.addf %488, %484 : vector<8x128xf32>
      %c0_156 = arith.constant 0 : index
      %c0_157 = arith.constant 0 : index
      %490 = vector.load %arg11[%c0_156, %c0_157] : memref<8x128xf32, #tpu.memory_space<vmem>>, vector<8x128xf32>
      tpu.vector_store %arg11[%c0_156, %c0_157], %489 {strides = array<i32>} : memref<8x128xf32, #tpu.memory_space<vmem>>, vector<8x128xf32>,
    } else {
    }
    return
  }
  func.func @transform_0(%arg0: i32, %arg1: i32, %arg2: i32) -> (i32, i32) {
    %c0_i32 = arith.constant 0 : i32
    return %arg1, %arg2 : i32, i32
  }
  func.func @transform_1(%arg0: i32, %arg1: i32, %arg2: i32) -> (i32, i32) {
    %c0_i32 = arith.constant 0 : i32
    return %arg0, %arg2 : i32, i32
  }
  func.func @transform_2(%arg0: i32, %arg1: i32, %arg2: i32) -> (i32, i32) {
    %c0_i32 = arith.constant 0 : i32
    return %arg0, %arg2 : i32, i32
  }
  func.func @transform_3(%arg0: i32, %arg1: i32, %arg2: i32) -> (i32, i32) {
    %c0_i32 = arith.constant 0 : i32
    return %arg0, %arg2 : i32, i32
  }
  func.func @transform_4(%arg0: i32, %arg1: i32, %arg2: i32) -> (i32, i32) {
    %c0_i32 = arith.constant 0 : i32
    %c0_i32_0 = arith.constant 0 : i32
    return %c0_i32, %arg0 : i32, i32
  }
  func.func @transform_5(%arg0: i32, %arg1: i32, %arg2: i32) -> (i32, i32) {
    %c0_i32 = arith.constant 0 : i32
    %c0_i32_0 = arith.constant 0 : i32
    return %c0_i32, %arg0 : i32, i32
  }
  func.func @transform_6(%arg0: i32, %arg1: i32, %arg2: i32) -> (i32, i32) {
    %c0_i32 = arith.constant 0 : i32
    %c0_i32_0 = arith.constant 0 : i32
    return %c0_i32, %arg0 : i32, i32
  }
  func.func @transform_7(%arg0: i32, %arg1: i32, %arg2: i32) -> (i32, i32) {
    %c0_i32 = arith.constant 0 : i32
    return %arg1, %arg0 : i32, i32
  }
  func.func @transform_8(%arg0: i32, %arg1: i32, %arg2: i32) -> (i32, i32) {
    %c0_i32 = arith.constant 0 : i32
    return %arg1, %arg0 : i32, i32
  }
  func.func @transform_9(%arg0: i32, %arg1: i32, %arg2: i32) -> (i32, i32) {
    %c0_i32 = arith.constant 0 : i32
    return %arg1, %arg0 : i32, i32
  }
}

</mosaic_0001>

<bundles_post_ra>
// kernel: tpu_custom_call.1
= control target key start
LH: loop header
LB: loop body
LE: loop exit
PB: predicated region body
PF: predicated region fallthrough
CT: control target
= control target key end

     0   :  { %s3622_s0 = inlined_call_operand.hbm [shape: bf16[32,256], index: 0, kind: input, shape index: {}]   ;;  %s3623_s1 = inlined_call_operand.hbm [shape: bf16[256,256], index: 1, kind: input, shape index: {}]   ;;  %s3624_s2 = inlined_call_operand.hbm [shape: bf16[256,256], index: 2, kind: input, shape index: {}]   ;;  %s3625_s3 = inlined_call_operand.hbm [shape: bf16[256,256], index: 3, kind: input, shape index: {}]   ;;  %s3626_s4 = inlined_call_operand.vmem [shape: f32[1,256], index: 4, kind: input, shape index: {}]   ;;  %s3627_s5 = inlined_call_operand.vmem [shape: f32[1,256], index: 5, kind: input, shape index: {}]   ;;  %s3628_s6 = inlined_call_operand.vmem [shape: f32[1,256], index: 6, kind: input, shape index: {}]   ;;  %s3629_s7 = inlined_call_operand.hbm [shape: f32[32,256], index: 7, kind: output, shape index: {0}]   ;;  %s3630_s8 = inlined_call_operand.hbm [shape: f32[16,256], index: 8, kind: output, shape index: {1}]   ;;  %s3631_s9 = inlined_call_operand.hbm [shape: f32[16,256], index: 9, kind: output, shape index: {2}]  }
   0x1   :  { %3666 = sst [smem:[#allocation39_spill]] %s3622_s0 }
   0x2   :  { %3667 = sst [smem:[#allocation40_spill]] %s3623_s1 }
   0x3   :  { %3668 = sst [smem:[#allocation41_spill]] %s3625_s3 }
   0x4   :  { %3669 = sst [smem:[#allocation42_spill]] %s3626_s4 }
   0x5   :  { %3670 = sst [smem:[#allocation43_spill]] %s3627_s5 }
   0x6   :  { %3671 = sst [smem:[#allocation44_spill]] %s3628_s6 }
   0x7   :  { %3672 = sst [smem:[#allocation45_spill]] %s3629_s7 }
   0x8   :  { %3673 = sst [smem:[#allocation46_spill]] %s3630_s8 }
   0x9   :  { %3674 = sst [smem:[#allocation47_spill]] %s3631_s9 }
   0xa   :  { %15 = vsyncpa [#allocation3], 0 }
   0xb   :  { %17 = vsyncpa [#allocation3 + $0x1], 0 }
   0xc   :  { %18 = vsyncpa [#allocation6], 0 }
   0xd   :  { %20 = vsyncpa [#allocation6 + $0x1], 0 }
   0xe   :  { %21 = vsyncpa [#allocation9], 0 }
   0xf   :  { %23 = vsyncpa [#allocation9 + $0x1], 0 }
  0x10   :  { %24 = vsyncpa [#allocation4], 0 }
  0x11   :  { %26 = vsyncpa [#allocation4 + $0x1], 0 }
  0x12   :  { %27 = vsyncpa [#allocation12], 0 }
  0x13   :  { %29 = vsyncpa [#allocation12 + $0x1], 0  ;;  %s2557_s30 = smov 0   ;;  %s2559_s10 = smov 0  }
  0x14   :  { %s2561_s11 = smov 0   ;;  %s2563_s12 = smov 0  }
  0x15   :  { %s2565_s13 = smov 0   ;;  %s2567_s14 = smov 0  }
  0x16   :  { %s2569_s15 = smov 0   ;;  %s2571_s16 = smov 0  }
  0x17   :  { %s2573_s17 = smov 0   ;;  %s2575_s18 = smov 0  }
  0x18   :  { %s2577_s19 = smov 0   ;;  %s2579_s20 = smov 0  }
  0x19   :  { %s2581_s21 = smov 0   ;;  %s2583_s22 = smov 0  }
  0x1a   :  { %s2585_s23 = smov 0   ;;  %s2587_s24 = smov 0  }
  0x1b LB: > { %3675 = sst [smem:[#allocation19_spill]] %s2437_s11  ;;  %s47_s25 = sadd.s32 1, %s2477_s21  ;;  %s2489_s24 = sphi %s2587_s24, %s35_s24   ;;  %s2485_s23 = sphi %s2585_s23, %s3756_s23   ;;  %s2481_s22 = sphi %s2583_s22, %s3763_s22   ;;  %s2477_s21 = sphi %s2581_s21, %s3754_s21   ;;  %s2473_s20 = sphi %s2579_s20, %s3753_s20   ;;  %s2469_s19 = sphi %s2577_s19, %s3752_s19   ;;  %s2465_s18 = sphi %s2575_s18, %s3751_s18   ;;  %s2461_s17 = sphi %s2573_s17, %s3750_s17   ;;  %s2457_s16 = sphi %s2571_s16, %s3762_s16   ;;  %s2453_s15 = sphi %s2569_s15, %s3748_s15   ;;  %s2449_s14 = sphi %s2567_s14, %s3761_s14   ;;  %s2445_s13 = sphi %s2565_s13, %s3760_s13   ;;  %s2441_s12 = sphi %s2563_s12, %s3759_s12   ;;  %s2437_s11 = sphi %s2561_s11, %s3746_s11   ;;  %s2433_s10 = sphi %s2559_s10, %s3758_s10   ;;  %s2429_s30 = sphi %s2557_s30, %s3757_s30  }
  0x1c   : > { %3676 = sst [smem:[#allocation20_spill]] %s2457_s16  ;;  %p2639_p0 = scmp.ge.s32.totalorder %s47_s25, 2 }
  0x1d   : > { %3677 = sst [smem:[#allocation21_spill]] %s2461_s17  ;;  %p71_p1 = scmp.eq.s32.totalorder %s2489_s24, 0 }
  0x1e   : > { %3678 = sst [smem:[#allocation22_spill]] %s2465_s18  ;;  %p98_p2 = scmp.ne.s32.totalorder %s2449_s14, %s2445_s13 }
  0x1f   : > { %3679 = sst [smem:[#allocation23_spill]] %s2469_s19  ;;  %s3765_s25 = smov (%p2639_p0, %s47_s25), 0 }
  0x20   : > { %3680 = sst [smem:[#allocation24_spill]] %s2473_s20  ;;  %p2653_p3 = por %p98_p2, %p71_p1 }
  0x21   : > { %3681 = sst [smem:[#allocation25_spill]] %s2477_s21  ;;  %p104_p4 = scmp.ne.s32.totalorder %s2445_s13, %s2441_s12 }
  0x22   : > { %3682 = sst [smem:[#allocation26_spill]] %s2481_s22  ;;  %s2661_s26 = ssub.s32 %s2477_s21, %s3765_s25 }
  0x23   : > { %3683 = sst [smem:[#allocation27_spill]] %s2485_s23  ;;  %p3640_p5 = scmp.lt.s32.totalorder %s2489_s24, 8 }
  0x24   : > { %3685 = sst [smem:[#allocation28_spill]] %s3765_s25  ;;  %s369_s9 = sand.u32 1, %s2489_s24  }
  0x25   : > { %s3641_s28 = sand.u32 1, %s2449_s14   ;;  %s1652_s8 = sshll.u32 %s2485_s23, 5 }
  0x26   : > { %s2668_s7 = sshll.u32 %s3641_s28, 6  ;;  %s379_s19 = sadd.s32 %s2477_s21, %s1652_s8 }
  0x27   : > { %s373_s6 = scalar_lea.vmem [#allocation5], %s2668_s7  ;;  %s2673_s4 = sshll.u32 %s379_s19, 6 }
  0x28   : > { %s382_s5 = sshll.u32 %s373_s6, 4  ;;  %s3687_s1 = sld [smem:[#allocation40_spill]]  ;;  %s383_s5 = int_to_ptr.vmem [resolvable:$true] %s382_s5 }
  0x29   : > { %p2683_p6 = pnand %p3640_p5, %p2653_p3  ;;  %p1628_p7 = scmp.ge.s32.totalorder %s2489_s24, 1 }
  0x2a   : > { %p454_p8 = scmp.lt.s32.totalorder %s2489_s24, 9  ;;  %s2689_s8 = scalar_lea.sflag [#allocation6], %s369_s9 }
  0x2b   : > { %p3660_p9 = pneg %p2683_p6  ;;  %s2166_s6 = scalar_lea.vmem %s383_s5, 1024 }
  0x2c   : > { %p2167_p10 = scmp.ne.s32.totalorder %s383_s5, %s2166_s6  ;;  %s2491_s18 = smov [#allocation5]  }
  0x2d   : > { %s2171_s19 = sshll.u32 %s2491_s18, 4  ;;  %s2172_s19 = int_to_ptr.vmem [resolvable:$false] %s2171_s19 }
  0x2e   : > { %s381_s25 = scalar_lea.hbm %s3687_s1, %s2673_s4  ;;  %p2169_p11 = pnand %p2167_p10, %p3660_p9 }
  0x2f   : > { %s2173_s20 = scalar_lea.vmem %s2172_s19, 2048  ;;  %p2174_p13 = scmp.lt.s32.totalorder %s383_s5, %s2172_s19 }
  0x30   : > { %p2170_p12 = pneg %p2169_p11  ;;  %p2175_p2 = scmp.lt.s32.totalorder %s2173_s20, %s2166_s6 }
  0x32   : > { %p2176_p3 = por %p2175_p2, %p2174_p13 }
  0x34   : > { %p2177_p5 = pnand %p2176_p3, %p2170_p12 }
  0x36   : > { %2180 = shalt.err (!%p2177_p5)
}
  0x37   : > { %s3642_s29 = smov 128   ;;  %s3644_s9 = smov 64  }
  0x38   : > { %s3646_s6 = smov 4   ;;  %p2706_p5 = pnand %p1628_p7, %p454_p8 }
  0x39   : > { %1822 = dma.hbm_to_vmem [thread:$0]  (!%p2683_p6), %s381_s25, 1024, %s383_s5, %s2689_s8, %s3642_s29, %s3644_s9, %s3646_s6  }
  0x3a   : > { %s2711_s19 = sadd.s32 4294967295, %s2489_s24   ;;  %s50_s28 = sadd.s32 1, %s2481_s22 }
  0x3b   : > { %s63_s1 = sadd.s32 1, %s2461_s17  ;;  %s3767_s28 = smov (!%p2639_p0, %s50_s28), %s2481_s22 }
  0x3c   : > { %p70_p10 = scmp.ne.s32.totalorder %s2461_s17, %s2457_s16  ;;  %p76_p11 = scmp.ne.s32.totalorder %s2457_s16, %s2453_s15 }
  0x3d   : > { %p52_p7 = scmp.ge.s32.totalorder %s3767_s28, 2  ;;  %p77_p8 = scmp.eq.s32.totalorder %s2711_s19, 0 }
  0x3e   : > { %p2726_p12 = por %p71_p1, %p70_p10  ;;  %s253_s25 = sadd.s32 1, %s2437_s11 }
  0x3f   : > { %s3769_s28 = smov (%p52_p7, %s3767_s28), 0  ;;  %s3692_s29 = sadd.s32 1, %s2485_s23 }
  0x40   : > { %3691 = sst [smem:[#allocation29_spill]] %s3769_s28  ;;  %s3771_s29 = smov (!%p52_p7, %s3692_s29), %s2485_s23 }
  0x41   : > { %s58_s15 = ssub.s32 %s2481_s22, %s3769_s28  ;;  %p2738_p0 = por %p77_p8, %p76_p11 }
  0x42   : > { %p56_p1 = scmp.ge.s32.totalorder %s3771_s29, 2  ;;  %s60_s9 = sor.u32 %s2661_s26, %s58_s15 }
  0x43   : > { %s3693_s27 = scalar_select %p2738_p0, 1, 0 }
  0x44   : > { %p61_p13 = scmp.eq.s32.totalorder %s60_s9, 0  ;;  %p2746_p2 = por %p104_p4, %p77_p8 }
  0x45   : > { %3694 = sst [smem:[#allocation30_spill]] %s3693_s27  ;;  %s3773_s29 = smov (%p56_p1, %s3771_s29), 0 }
  0x46   : > { %s3695_s6 = scalar_select %p2746_p2, 1, 0 }
  0x47   : > { %3697 = sst [smem:[#allocation32_spill]] %s3773_s29  ;;  %s86_s28 = ssub.s32 %s2485_s23, %s3773_s29 }
  0x48   : > { %3696 = sst [smem:[#allocation31_spill]] %s3695_s6  ;;  %p263_p3 = scmp.ne.s32.totalorder %s2437_s11, %s2433_s10 }
  0x49   : > { %s2753_s20 = scalar_select %p61_p13, %s2461_s17, %s63_s1  }
  0x4a   : > { %s88_s27 = sor.u32 %s86_s28, %s2661_s26  ;;  %s250_s16 = sor.u32 %s86_s28, %s58_s15 }
  0x4b   : > { %3698 = sst [smem:[#allocation33_spill]] %s2753_s20  ;;  %p89_p10 = scmp.eq.s32.totalorder %s88_s27, 0 }
  0x4c   : > { %p251_p11 = scmp.eq.s32.totalorder %s250_s16, 0  ;;  %p264_p7 = scmp.eq.s32.totalorder %s2711_s19, 7 }
  0x4d   : > { %p269_p4 = scmp.ne.s32.totalorder %s2433_s10, %s2429_s30  ;;  %s3699_s12 = sadd.s32 1, %s2449_s14 }
  0x4e   : > { %s2766_s9 = scalar_select %p89_p10, %s2449_s14, %s3699_s12  }
  0x4f   : > { %s2769_s6 = scalar_select %p251_p11, %s2437_s11, %s253_s25  }
  0x50   : > { %3700 = sst [smem:[#allocation34_spill]] %s2766_s9  ;;  %p2771_p8 = por %p264_p7, %p263_p3 }
  0x51   : > { %3701 = sst [smem:[#allocation35_spill]] %s2769_s6  ;;  %s3703_s29 = sadd.s32 4294967294, %s2489_s24  }
  0x52   : > { %s3702_s1 = scalar_select %p2771_p8, 1, 0 }
  0x53   : > { %p270_p1 = scmp.eq.s32.totalorder %s3703_s29, 7  ;;  %s346_s26 = sand.u32 1, %s2461_s17  }
  0x54   : > { %s1651_s28 = sshll.u32 %s2481_s22, 2  ;;  %s1612_s15 = sshll.u32 %s346_s26, 3 }
  0x55   : > { %p2779_p13 = por %p270_p1, %p269_p4  ;;  %s356_s27 = sadd.s32 %s2477_s21, %s1651_s28 }
  0x56   : > { %s1615_s23 = sshll.u32 %s356_s27, 6  ;;  %s3705_s0 = sld [smem:[#allocation39_spill]] }
  0x57   : > { %s3704_s16 = scalar_select %p2779_p13, 1, 0 }
  0x58   : > { %s350_s9 = scalar_lea.vmem [#allocation2], %s1612_s15  ;;  %p3706_p3 = scmp.lt.s32.totalorder %s2489_s24, 8 }
  0x59   : > { %s359_s6 = sshll.u32 %s350_s9, 4  ;;  %s404_s11 = scalar_lea.hbm %s3624_s2, %s2673_s4  ;;  %s360_s6 = int_to_ptr.vmem [resolvable:$true] %s359_s6 }
  0x5a   : > { %p2791_p10 = pnand %p3706_p3, %p2726_p12  ;;  %s396_s28 = scalar_lea.vmem [#allocation7], %s2668_s7 }
  0x5b   : > { %s405_s27 = sshll.u32 %s396_s28, 4  ;;  %s347_s21 = scalar_lea.sflag [#allocation3], %s346_s26  ;;  %s406_s27 = int_to_ptr.vmem [resolvable:$true] %s405_s27 }
  0x5c   : > { %s358_s25 = scalar_lea.hbm %s3705_s0, %s1615_s23  ;;  %p2183_p11 = pneg %p2791_p10 }
  0x5d   : > { %s2194_s23 = scalar_lea.vmem %s360_s6, 128  ;;  %s2495_s20 = smov [#allocation2]  }
  0x5e   : > { %p2195_p7 = scmp.ne.s32.totalorder %s360_s6, %s2194_s23  ;;  %s2199_s5 = sshll.u32 %s2495_s20, 4  ;;  %s2200_s5 = int_to_ptr.vmem [resolvable:$false] %s2199_s5 }
  0x5f   : > { %s2201_s9 = scalar_lea.vmem %s2200_s5, 256  ;;  %p2202_p12 = scmp.lt.s32.totalorder %s360_s6, %s2200_s5 }
  0x60   : > { %p2197_p4 = pnand %p2195_p7, %p2183_p11  ;;  %p2203_p3 = scmp.lt.s32.totalorder %s2201_s9, %s2194_s23 }
  0x62   : > { %p2198_p1 = pneg %p2197_p4  ;;  %p2204_p9 = por %p2203_p3, %p2202_p12 }
  0x64   : > { %p2205_p13 = pnand %p2204_p9, %p2198_p1 }
  0x66   : > { %2208 = shalt.err (!%p2205_p13)
}
  0x67   : > { %s3708_s17 = smov 4   ;;  %s3709_s22 = smov 64  }
  0x68   : > { %s3710_s26 = smov 128   ;;  %s2222_s15 = scalar_lea.vmem %s406_s27, 1024 }
  0x69   : > { %1819 = dma.hbm_to_vmem [thread:$0]  (!%p2791_p10), %s358_s25, 128, %s360_s6, %s347_s21, %s3710_s26, %s3709_s22, %s3708_s17  }
  0x6a   : > { %p2223_p11 = scmp.ne.s32.totalorder %s406_s27, %s2222_s15  ;;  %p3711_p7 = pneg %p2683_p6 }
  0x6b   : > { %s2496_s12 = smov [#allocation7]  }
  0x6c   : > { %p2225_p4 = pnand %p2223_p11, %p3711_p7  ;;  %s2227_s28 = sshll.u32 %s2496_s12, 4  ;;  %s2228_s28 = int_to_ptr.vmem [resolvable:$false] %s2227_s28 }
  0x6d   : > { %s2229_s23 = scalar_lea.vmem %s2228_s28, 2048  ;;  %p2230_p9 = scmp.lt.s32.totalorder %s406_s27, %s2228_s28 }
  0x6e   : > { %p2226_p8 = pneg %p2225_p4  ;;  %p2231_p13 = scmp.lt.s32.totalorder %s2229_s23, %s2222_s15 }
  0x70   : > { %p2232_p1 = por %p2231_p13, %p2230_p9 }
  0x72   : > { %p2233_p12 = pnand %p2232_p1, %p2226_p8 }
  0x74   : > { %2236 = shalt.err (!%p2233_p12)
}
  0x75   : > { %1825 = dma.hbm_to_vmem [thread:$0]  (!%p2683_p6), %s404_s11, 1024, %s406_s27, %s2689_s8, %s3710_s26, %s3709_s22, %s3708_s17  }
  0x76   : > { %s3712_s20 = sld [smem:[#allocation41_spill]]  ;;  %s419_s9 = scalar_lea.vmem [#allocation8], %s2668_s7 }
  0x77   : > { %s428_s15 = sshll.u32 %s419_s9, 4  ;;  %s3713_s12 = sand.u32 1, %s2449_s14   ;;  %s429_s15 = int_to_ptr.vmem [resolvable:$true] %s428_s15 }
  0x78   : > { %s416_s28 = scalar_lea.sflag [#allocation9], %s3713_s12  ;;  %s2250_s23 = scalar_lea.vmem %s429_s15, 1024 }
  0x79   : > { %p2251_p8 = scmp.ne.s32.totalorder %s429_s15, %s2250_s23  ;;  %p3714_p10 = pmov %p3711_p7 }
  0x7a   : > { %s2497_s21 = smov [#allocation8]  }
  0x7b   : > { %p2253_p3 = pnand %p2251_p8, %p3714_p10  ;;  %s2255_s6 = sshll.u32 %s2497_s21, 4  ;;  %s2256_s6 = int_to_ptr.vmem [resolvable:$false] %s2255_s6 }
  0x7c   : > { %s427_s5 = scalar_lea.hbm %s3712_s20, %s2673_s4  ;;  %s2257_s0 = scalar_lea.vmem %s2256_s6, 2048 }
  0x7d   : > { %p2254_p11 = pneg %p2253_p3  ;;  %p2258_p7 = scmp.lt.s32.totalorder %s429_s15, %s2256_s6 }
  0x7e   : > { %p2259_p4 = scmp.lt.s32.totalorder %s2257_s0, %s2250_s23 }
  0x80   : > { %p2260_p9 = por %p2259_p4, %p2258_p7 }
  0x82   : > { %p2261_p13 = pnand %p2260_p9, %p2254_p11 }
  0x84   : > { %2264 = shalt.err (!%p2261_p13)
}
  0x85   : > { %1828 = dma.hbm_to_vmem [thread:$0]  (!%p2683_p6), %s427_s5, 1024, %s429_s15, %s416_s28, %s3710_s26, %s3709_s22, %s3708_s17  }
  0x86   : > { %458 = sbr.rel (%p2706_p5) target bundleno = 823 (0x337), region = 48 }
  0x8b   : > { %s3715_s4 = sld [smem:[#allocation20_spill]] }
  0x91   : > { %s460_s11 = sand.u32 1, %s3715_s4  }
  0x92   : > { %s2839_s8 = sshll.u32 %s460_s11, 3  ;;  %s461_s27 = scalar_lea.sflag [#allocation3], %s460_s11 }
  0x93   : > { %s464_s0 = scalar_lea.vmem [#allocation2], %s2839_s8 }
  0x94   : > { %2408 = dma.done.wait (%p2738_p0), %s461_s27, 128  }
  0x95   : > { %2410 = vsyncadd (%p2738_p0), %s461_s27, 4294967168  ;;  %s3662_s17 = sand.u32 1, %s2711_s19   ;;  %s471_s18 = sand.u32 1, %s2445_s13  }
  0x96   : > { %s1630_s22 = sshll.u32 %s471_s18, 6  ;;  %s470_s26 = scalar_lea.sflag [#allocation6], %s3662_s17 }
  0x97   : > { %s2850_s25 = scalar_lea.vmem [#allocation5], %s1630_s22 }
  0x98   : > { %2412 = dma.done.wait (%p2746_p2), %s470_s26, 2048  }
  0x99   : > { %2414 = vsyncadd (%p2746_p2), %s470_s26, 4294965248  ;;  %s2856_s29 = scalar_lea.vmem [#allocation7], %s1630_s22  ;;  %s488_s20 = scalar_lea.sflag [#allocation9], %s471_s18 }
  0x9a   : > { %s2858_s5 = scalar_lea.vmem [#allocation8], %s1630_s22 }
  0x9b   : > { %2416 = dma.done.wait (%p2746_p2), %s488_s20, 1024  }
  0x9c   : > { %2418 = vsyncadd (%p2746_p2), %s488_s20, 4294966272  ;;  %s3718_s9 = sld [smem:[#allocation24_spill]]  ;;  %s2865_s12 = sand.u32 1, %s2433_s10   ;;  %v2888_v0 = vld [vmem:[%s2856_s29] sm:$0xff]   ;;  %v2891_v1 = vld [vmem:[%s2856_s29 + $0x8] sm:$0xff]  }
  0x9d   : > { %s3719_s15 = sld [smem:[#allocation22_spill]]  ;;  %s1633_s28 = sshll.u32 %s2865_s12, 4  ;;  %v2894_v2 = vld [vmem:[%s2856_s29 + $0x10] sm:$0xff]   ;;  %v1658_v3 = vunpack.c.l.bf16 %v2888_v0  ;;  %v1659_v4 = vunpack.c.h.bf16 %v2888_v0  ;;  %v1662_v5 = vunpack.c.l.bf16 %v2891_v1  ;;  %v1663_v6 = vunpack.c.h.bf16 %v2891_v1  ;;  %v2901_v7 = vld [vmem:[%s2856_s29 + $0x18] sm:$0xff]   ;;  %v2906_v10 = vld [vmem:[%s2856_s29 + $0x20] sm:$0xff]  }
  0x9e   : > { %s1634_s23 = sshll.u32 %s2865_s12, 3  ;;  %s3720_s4 = sld [smem:[#allocation42_spill]]  ;;  %v1666_v8 = vunpack.c.l.bf16 %v2894_v2  ;;  %v1667_v9 = vunpack.c.h.bf16 %v2894_v2  ;;  %v1670_v11 = vunpack.c.l.bf16 %v2901_v7  ;;  %v2910_v12 = vld [vmem:[%s2856_s29 + $0x28] sm:$0xff]   ;;  %v1671_v15 = vunpack.c.h.bf16 %v2901_v7  ;;  %v2928_v23 = vld [vmem:[%s2856_s29 + $0x30] sm:$0xff]   ;;  %v2935_v28 = vld [vmem:[%s2856_s29 + $0x38] sm:$0xff]  }
  0x9f   : > { %s3721_s3 = sld [smem:[#allocation43_spill]]  ;;  %v655_v13 = vand.u32 2147483647, %v1658_v3  ;;  %v656_v14 = vand.u32 2147483647, %v1659_v4  ;;  %v1674_v18 = vunpack.c.l.bf16 %v2906_v10  ;;  %v1675_v19 = vunpack.c.h.bf16 %v2906_v10  ;;  %s3227_s29 = scalar_lea.vmem [#allocation11], %s1634_s23 }
  0xa0   : > { %s3722_s20 = sld [smem:[#allocation44_spill]]  ;;  %v657_v16 = vand.u32 2147483647, %v1662_v5  ;;  %v658_v17 = vand.u32 2147483647, %v1663_v6  ;;  %v1678_v21 = vunpack.c.l.bf16 %v2910_v12  ;;  %v1679_v22 = vunpack.c.h.bf16 %v2910_v12  ;;  %v3059_v12 = vld [vmem:[%s2850_s25 + $0x8] sm:$0xff]  }
  0xa1   : > { %v659_v20 = vand.u32 2147483647, %v1666_v8  ;;  %v660_v24 = vand.u32 2147483647, %v1667_v9  ;;  %v661_v25 = vand.u32 2147483647, %v1670_v11  ;;  %v1682_v32 = vunpack.c.l.bf16 %v2928_v23 }
  0xa2   : > { %p564_p6 = scmp.lt.s32.totalorder %s3718_s9, 1  ;;  %v671_v26 = vsub.f32 0.0, %v655_v13  ;;  %v672_v27 = vsub.f32 0.0, %v656_v14  ;;  %v662_v29 = vand.u32 2147483647, %v1671_v15  ;;  %v673_v30 = vsub.f32 0.0, %v657_v16 }
  0xa3   : > { %p847_p5 = scmp.eq.s32.totalorder %s3719_s15, 0  ;;  %v674_v31 = vsub.f32 0.0, %v658_v17  ;;  %v663_v33 = vand.u32 2147483647, %v1674_v18  ;;  %v664_v34 = vand.u32 2147483647, %v1675_v19  ;;  %v1683_v36 = vunpack.c.h.bf16 %v2928_v23 }
  0xa4   : > { %s3775_s9 = smov (!%p564_p6, %s3718_s9), 1  ;;  %v675_v35 = vsub.f32 0.0, %v659_v20  ;;  %v665_v37 = vand.u32 2147483647, %v1678_v21  ;;  %v666_v38 = vand.u32 2147483647, %v1679_v22  ;;  %v1686_v40 = vunpack.c.l.bf16 %v2935_v28 }
  0xa5   : > { %s2875_s7 = scalar_lea.vmem %s3720_s4, %s3775_s9  ;;  %s2880_s18 = scalar_lea.vmem %s3721_s3, %s3775_s9  ;;  %v676_v39 = vsub.f32 0.0, %v660_v24  ;;  %v677_v41 = vsub.f32 0.0, %v661_v25  ;;  %v687_v42 = vmul.f32 1.442695, %v671_v26  ;;  %v689_v43 = vmul.f32 1.442695, %v672_v27 }
  0xa6   : > { %s2885_s17 = scalar_lea.vmem %s3722_s20, %s3775_s9  ;;  %v1687_v44 = vunpack.c.h.bf16 %v2935_v28  ;;  %v678_v45 = vsub.f32 0.0, %v662_v29  ;;  %v691_v46 = vmul.f32 1.442695, %v673_v30  ;;  %v693_v47 = vmul.f32 1.442695, %v674_v31  ;;  %v1689_v24 = vld [vmem:[%s2858_s5] sm:$0xff]  }
  0xa7   : > { %v667_v48 = vand.u32 2147483647, %v1682_v32  ;;  %v679_v49 = vsub.f32 0.0, %v663_v33  ;;  %1978 = vpow2.f32 %v687_v42  ;;  %v695_v50 = vmul.f32 1.442695, %v675_v35  ;;  %v1759_v26 = vld [vmem:[%s2858_s5 + $0x8] sm:$0xff]  }
  0xa8   : > { %v668_v51 = vand.u32 2147483647, %v1683_v36  ;;  %v680_v52 = vsub.f32 0.0, %v664_v34  ;;  %1980 = vpow2.f32 %v689_v43  ;;  %v697_v53 = vmul.f32 1.442695, %v676_v39  ;;  %v1760_v29 = vld [vmem:[%s2858_s5 + $0x10] sm:$0xff]  }
  0xa9   : > { %v669_v54 = vand.u32 2147483647, %v1686_v40  ;;  %v681_v55 = vsub.f32 0.0, %v665_v37  ;;  %1982 = vpow2.f32 %v691_v46  ;;  %v699_v56 = vmul.f32 1.442695, %v677_v41  ;;  %v1761_v33 = vld [vmem:[%s2858_s5 + $0x18] sm:$0xff]  }
  0xaa   : > { %v670_v57 = vand.u32 2147483647, %v1687_v44  ;;  %v682_v58 = vsub.f32 0.0, %v666_v38  ;;  %1984 = vpow2.f32 %v693_v47  ;;  %v701_v59 = vmul.f32 1.442695, %v678_v45  ;;  %v1762_v39 = vld [vmem:[%s2858_s5 + $0x20] sm:$0xff]  }
  0xab   : > { %v683_v60 = vsub.f32 0.0, %v667_v48  ;;  %1986 = vpow2.f32 %v695_v50  ;;  %v703_v61 = vmul.f32 1.442695, %v679_v49  ;;  %v684_v62 = vsub.f32 0.0, %v668_v51  ;;  %v1763_v45 = vld [vmem:[%s2858_s5 + $0x28] sm:$0xff]   ;;  %v1764_v50 = vld [vmem:[%s2858_s5 + $0x30] sm:$0xff]  }
  0xac   : > { %1988 = vpow2.f32 %v697_v53  ;;  %v705_v63 = vmul.f32 1.442695, %v680_v52  ;;  %v685_v13 = vsub.f32 0.0, %v669_v54  ;;  %v707_v14 = vmul.f32 1.442695, %v681_v55  ;;  %v1765_v55 = vld [vmem:[%s2858_s5 + $0x38] sm:$0xff]  }
  0xad   : > { %1990 = vpow2.f32 %v699_v56  ;;  %v686_v16 = vsub.f32 0.0, %v670_v57  ;;  %v709_v17 = vmul.f32 1.442695, %v682_v58  ;;  %v711_v20 = vmul.f32 1.442695, %v683_v60  ;;  %v3070_v23 = vld [vmem:[%s2850_s25 + $0x10] sm:$0xff]  }
  0xae   : > { %1992 = vpow2.f32 %v701_v59  ;;  %v713_v25 = vmul.f32 1.442695, %v684_v62  ;;  %v715_v27 = vmul.f32 1.442695, %v685_v13  ;;  %v2962_v31 = vunpack.c.l.bf16 %v1689_v24  ;;  %s3231_s5 = scalar_lea.vmem [#allocation13], %s1634_s23  ;;  %p1636_p0 = scmp.ne.s32.totalorder %s3719_s15, 0 }
  0xaf   : > { %1994 = vpow2.f32 %v703_v61  ;;  %v717_v30 = vmul.f32 1.442695, %v686_v16  ;;  %v2965_v35 = vunpack.c.h.bf16 %v1689_v24  ;;  %v2967_v37 = vunpack.c.l.bf16 %v1759_v26 }
  0xb0   : > { %1996 = vpow2.f32 %v705_v63  ;;  %v2969_v38 = vunpack.c.h.bf16 %v1759_v26  ;;  %v2972_v42 = vunpack.c.l.bf16 %v1760_v29  ;;  %v2974_v43 = vunpack.c.h.bf16 %v1760_v29 }
  0xb1   : > { %1998 = vpow2.f32 %v707_v14  ;;  %v2977_v48 = vunpack.c.l.bf16 %v1761_v33  ;;  %v2979_v49 = vunpack.c.h.bf16 %v1761_v33  ;;  %v2982_v53 = vunpack.c.l.bf16 %v1762_v39 }
  0xb2   : > { %2000 = vpow2.f32 %v709_v17  ;;  %v2984_v54 = vunpack.c.h.bf16 %v1762_v39  ;;  %v2987_v58 = vunpack.c.l.bf16 %v1763_v45  ;;  %v2989_v59 = vunpack.c.h.bf16 %v1763_v45 }
  0xb3   : > { %2002 = vpow2.f32 %v711_v20  ;;  %v2991_v62 = vunpack.c.l.bf16 %v1764_v50  ;;  %v2993_v63 = vunpack.c.h.bf16 %v1764_v50  ;;  %v2995_v16 = vunpack.c.l.bf16 %v1765_v55 }
  0xb4   : > { %v1979_v34 = vpop.eup %1978  ;;  %2004 = vpow2.f32 %v713_v25  ;;  %v2997_v17 = vunpack.c.h.bf16 %v1765_v55  ;;  %v3001_v25 = vmax.f32 %v1658_v3, 0.0  ;;  %v3005_v26 = vmax.f32 %v1659_v4, 0.0 }
  0xb5   : > { %v1981_v41 = vpop.eup %1980  ;;  %2006 = vpow2.f32 %v715_v27  ;;  %v719_v46 = vadd.f32 1.0, %v1979_v34  ;;  %3723 = vst [vmem:[#allocation36_spill] sm:$0xff] %v2995_v16  ;;  %v3013_v33 = vmax.f32 %v1663_v6, 0.0  ;;  %v3017_v3 = vmax.f32 %v1666_v8, 0.0 }
  0xb6   : > { %v1983_v47 = vpop.eup %1982  ;;  %2008 = vpow2.f32 %v717_v30  ;;  %v720_v51 = vadd.f32 1.0, %v1981_v41  ;;  %3724 = vst [vmem:[#allocation37_spill] sm:$0xff] %v2997_v17  ;;  %v3009_v30 = vmax.f32 %v1662_v5, 0.0  ;;  %v3021_v0 = vmax.f32 %v1667_v9, 0.0 }
  0xb7   : > { %v1985_v52 = vpop.eup %1984  ;;  %v721_v56 = vadd.f32 1.0, %v1983_v47  ;;  %2010 = vlog2.f32 %v719_v46  ;;  %v3025_v1 = vmax.f32 %v1670_v11, 0.0  ;;  %v3029_v6 = vmax.f32 %v1671_v15, 0.0 }
  0xb8   : > { %v1987_v57 = vpop.eup %1986  ;;  %v722_v60 = vadd.f32 1.0, %v1985_v52  ;;  %2012 = vlog2.f32 %v720_v51  ;;  %v3033_v2 = vmax.f32 %v1674_v18, 0.0  ;;  %v3037_v9 = vmax.f32 %v1675_v19, 0.0  ;;  %v3048_v18 = vld [vmem:[%s2850_s25] sm:$0xff]  }
  0xb9   : > { %v1989_v61 = vpop.eup %1988  ;;  %v723_v13 = vadd.f32 1.0, %v1987_v57  ;;  %2014 = vlog2.f32 %v721_v56  ;;  %v3041_v7 = vmax.f32 %v1678_v21, 0.0  ;;  %v3045_v15 = vmax.f32 %v1679_v22, 0.0  ;;  %v3075_v57 = vld [vmem:[%s2850_s25 + $0x18] sm:$0xff]  }
  0xba   : > { %v1991_v14 = vpop.eup %1990  ;;  %v724_v20 = vadd.f32 1.0, %v1989_v61  ;;  %2016 = vlog2.f32 %v722_v60  ;;  %v3052_v10 = vmax.f32 %v1682_v32, 0.0  ;;  %v3056_v19 = vmax.f32 %v1683_v36, 0.0  ;;  %v3080_v61 = vld [vmem:[%s2850_s25 + $0x20] sm:$0xff]  }
  0xbb   : > { %v1993_v24 = vpop.eup %1992  ;;  %v725_v27 = vadd.f32 1.0, %v1991_v14  ;;  %2018 = vlog2.f32 %v723_v13  ;;  %v3063_v50 = vmax.f32 %v1686_v40, 0.0  ;;  %v3067_v51 = vmax.f32 %v1687_v44, 0.0 }
  0xbc   : > { %v1995_v29 = vpop.eup %1994  ;;  %v726_v34 = vadd.f32 1.0, %v1993_v24  ;;  %2020 = vlog2.f32 %v724_v20  ;;  %v1722_v55 = vunpack.c.l.bf16 %v3048_v18  ;;  %v1723_v56 = vunpack.c.h.bf16 %v3048_v18 }
  0xbd   : > { %v1997_v39 = vpop.eup %1996  ;;  %v727_v4 = vadd.f32 1.0, %v1995_v29  ;;  %2022 = vlog2.f32 %v725_v27  ;;  %v1726_v28 = vunpack.c.l.bf16 %v3059_v12  ;;  %v1727_v44 = vunpack.c.h.bf16 %v3059_v12  ;;  %v3085_v27 = vld [vmem:[%s2850_s25 + $0x28] sm:$0xff]  }
  0xbe   : > { %v1999_v5 = vpop.eup %1998  ;;  %v728_v41 = vadd.f32 1.0, %v1997_v39  ;;  %2024 = vlog2.f32 %v726_v34  ;;  %v1730_v20 = vunpack.c.l.bf16 %v3070_v23  ;;  %v1731_v24 = vunpack.c.h.bf16 %v3070_v23 }
  0xbf   : > { %v2001_v8 = vpop.eup %2000  ;;  %v729_v45 = vadd.f32 1.0, %v1999_v5  ;;  %2026 = vlog2.f32 %v727_v4  ;;  %v1734_v39 = vunpack.c.l.bf16 %v3075_v57  ;;  %v1735_v4 = vunpack.c.h.bf16 %v3075_v57  ;;  %v3090_v5 = vld [vmem:[%s2850_s25 + $0x30] sm:$0xff]  }
  0xc0   : > { %v2003_v11 = vpop.eup %2002  ;;  %v730_v46 = vadd.f32 1.0, %v2001_v8  ;;  %2028 = vlog2.f32 %v728_v41  ;;  %v1742_v12 = vunpack.c.l.bf16 %v3085_v27 }
  0xc1   : > { %v2005_v47 = vpop.eup %2004  ;;  %v731_v21 = vadd.f32 1.0, %v2003_v11  ;;  %2030 = vlog2.f32 %v729_v45  ;;  %v1738_v11 = vunpack.c.l.bf16 %v3080_v61 }
  0xc2   : > { %v2007_v22 = vpop.eup %2006  ;;  %v732_v32 = vadd.f32 1.0, %v2005_v47  ;;  %2032 = vlog2.f32 %v730_v46  ;;  %v1739_v46 = vunpack.c.h.bf16 %v3080_v61 }
  0xc3   : > { %v2009_v36 = vpop.eup %2008  ;;  %v733_v52 = vadd.f32 1.0, %v2007_v22  ;;  %2034 = vlog2.f32 %v731_v21  ;;  %v1743_v22 = vunpack.c.h.bf16 %v3085_v27 }
  0xc4   : > { %v2011_v40 = vpop.eup %2010  ;;  %v734_v60 = vadd.f32 1.0, %v2009_v36  ;;  %2036 = vlog2.f32 %v732_v32 }
  0xc5   : > { %v2013_v13 = vpop.eup %2012  ;;  %v736_v14 = vmul.f32 0.6931472, %v2011_v40  ;;  %2038 = vlog2.f32 %v733_v52 }
  0xc6   : > { %v2015_v29 = vpop.eup %2014  ;;  %v738_v34 = vmul.f32 0.6931472, %v2013_v13  ;;  %2040 = vlog2.f32 %v734_v60 }
  0xc7   : > { %v2017_v41 = vpop.eup %2016  ;;  %v740_v8 = vmul.f32 0.6931472, %v2015_v29  ;;  %v3093_v45 = vadd.f32 %v736_v14, %v3001_v25 }
  0xc8   : > { %v2019_v18 = vpop.eup %2018  ;;  %v742_v47 = vmul.f32 0.6931472, %v2017_v41  ;;  %v3098_v21 = vadd.f32 %v738_v34, %v3005_v26 }
  0xc9   : > { %v2021_v32 = vpop.eup %2020  ;;  %v744_v23 = vmul.f32 0.6931472, %v2019_v18  ;;  %v3103_v36 = vadd.f32 %v740_v8, %v3009_v30  ;;  %v815_v52 = vmul.f32 %v2962_v31, %v3093_v45 }
  0xca   : > { %v2023_v57 = vpop.eup %2022  ;;  %v746_v40 = vmul.f32 0.6931472, %v2021_v32  ;;  %v3109_v60 = vadd.f32 %v742_v47, %v3013_v33  ;;  %v816_v13 = vmul.f32 %v2965_v35, %v3098_v21 }
  0xcb   : > { %v2025_v14 = vpop.eup %2024  ;;  %v748_v29 = vmul.f32 0.6931472, %v2023_v57  ;;  %v3115_v30 = vadd.f32 %v744_v23, %v3017_v3  ;;  %v817_v34 = vmul.f32 %v2967_v37, %v3103_v36  ;;  %v3119_v41 = vadd.f32 %v1722_v55, %v815_v52 }
  0xcc   : > { %v2027_v8 = vpop.eup %2026  ;;  %v750_v18 = vmul.f32 0.6931472, %v2025_v14  ;;  %v3122_v33 = vadd.f32 %v746_v40, %v3021_v0  ;;  %v818_v47 = vmul.f32 %v2969_v38, %v3109_v60  ;;  %v3126_v32 = vadd.f32 %v1723_v56, %v816_v13 }
  0xcd   : > { %v2029_v26 = vpop.eup %2028  ;;  %v752_v57 = vmul.f32 0.6931472, %v2027_v8  ;;  %v3129_v3 = vadd.f32 %v748_v29, %v3025_v1  ;;  %v819_v23 = vmul.f32 %v2972_v42, %v3115_v30  ;;  %v3133_v55 = vadd.f32 %v1726_v28, %v817_v34 }
  0xce   : > { %v2031_v52 = vpop.eup %2030  ;;  %v754_v14 = vmul.f32 0.6931472, %v2029_v26  ;;  %v3136_v0 = vadd.f32 %v750_v18, %v3029_v6  ;;  %v820_v40 = vmul.f32 %v2974_v43, %v3122_v33  ;;  %v3140_v56 = vadd.f32 %v1727_v44, %v818_v47 }
  0xcf   : > { %v2033_v13 = vpop.eup %2032  ;;  %v756_v8 = vmul.f32 0.6931472, %v2031_v52  ;;  %v3143_v1 = vadd.f32 %v752_v57, %v3033_v2  ;;  %v821_v28 = vmul.f32 %v2977_v48, %v3129_v3  ;;  %v3147_v29 = vadd.f32 %v1730_v20, %v819_v23 }
  0xd0   : > { %v2035_v26 = vpop.eup %2034  ;;  %v758_v34 = vmul.f32 0.6931472, %v2033_v13  ;;  %v3150_v6 = vadd.f32 %v754_v14, %v3037_v9  ;;  %v822_v44 = vmul.f32 %v2979_v49, %v3136_v0  ;;  %v3154_v18 = vadd.f32 %v1731_v24, %v820_v40  ;;  %v1772_v14 = vld [vmem:[%s2850_s25 + $0x38] sm:$0xff]   ;;  %s3223_s25 = scalar_lea.vmem [#allocation10], %s1633_s28 }
  0xd1   : > { %v2037_v47 = vpop.eup %2036  ;;  %v760_v52 = vmul.f32 0.6931472, %v2035_v26  ;;  %v3157_v2 = vadd.f32 %v756_v8, %v3041_v7  ;;  %v823_v57 = vmul.f32 %v2982_v53, %v3143_v1  ;;  %v3161_v20 = vadd.f32 %v1734_v39, %v821_v28 }
  0xd2   : > { %v2039_v23 = vpop.eup %2038  ;;  %v762_v13 = vmul.f32 0.6931472, %v2037_v47  ;;  %v3164_v9 = vadd.f32 %v758_v34, %v3045_v15  ;;  %v824_v24 = vmul.f32 %v2984_v54, %v3150_v6  ;;  %v3169_v40 = vadd.f32 %v1735_v4, %v822_v44 }
  0xd3   : > { %v2041_v26 = vpop.eup %2040  ;;  %v764_v25 = vmul.f32 0.6931472, %v2039_v23  ;;  %v3172_v7 = vadd.f32 %v760_v52, %v3052_v10  ;;  %v825_v39 = vmul.f32 %v2987_v58, %v3157_v2  ;;  %v3176_v8 = vadd.f32 %v1738_v11, %v823_v57 }
  0xd4   : > { %v766_v28 = vmul.f32 0.6931472, %v2041_v26  ;;  %v3179_v15 = vadd.f32 %v762_v13, %v3056_v19  ;;  %v826_v34 = vmul.f32 %v2989_v59, %v3164_v9  ;;  %v3185_v4 = vadd.f32 %v1739_v46, %v824_v24 }
  0xd5   : > { %v3188_v10 = vadd.f32 %v764_v25, %v3063_v50  ;;  %v1750_v44 = vunpack.c.l.bf16 %v1772_v14  ;;  %v827_v11 = vmul.f32 %v2991_v62, %v3172_v7  ;;  %v3194_v19 = vadd.f32 %v1742_v12, %v825_v39 }
  0xd6   : > { %v3197_v47 = vadd.f32 %v766_v28, %v3067_v51  ;;  %v1751_v61 = vunpack.c.h.bf16 %v1772_v14  ;;  %v828_v46 = vmul.f32 %v2993_v63, %v3179_v15  ;;  %v3203_v50 = vadd.f32 %v1743_v22, %v826_v34  ;;  %850 = sbr.rel (%p1636_p0) target bundleno = 267 (0x10b), region = 68 }
  0xd7   : > { %v829_v25 = vmul.f32 %v2995_v16, %v3188_v10  ;;  %v3726_v52 = vunpack.c.l.bf16 %v3090_v5  ;;  %v3727_v51 = vunpack.c.h.bf16 %v3090_v5 }
  0xd8   : > { %3725 = vst [vmem:[#allocation38_spill] sm:$0xff] %v3197_v47  ;;  %v830_v12 = vmul.f32 %v2997_v17, %v3197_v47 }
  0xd9   : > { %v3209_v57 = vadd.f32 %v3726_v52, %v827_v11  ;;  %v3215_v23 = vadd.f32 %v3727_v51, %v828_v46  ;;  %v3217_v13 = vadd.f32 %v1750_v44, %v829_v25 }
  0xda   : > { %v3219_v14 = vadd.f32 %v1751_v61, %v830_v12 }
  0xdb   : > { %v851_v27 = vld [vmem:[%s2880_s18] sm:$0x1]  ;;  %v2498_v22 = vmov 0.0   ;;  %v866_v34 = vlaneseq }
  0xdc   : > { %v853_v5 = vand.u32 2147483647, %v851_v27  ;;  %874 = vst [vmem:[%s3227_s29] sm:$0xff] %v2498_v22  ;;  %875 = vst [vmem:[%s3231_s5] sm:$0xff] %v2498_v22  ;;  %v852_v44 = vmax.f32 %v851_v27, 0.0  ;;  %v862_v25 = vld [vmem:[%s2885_s17] sm:$0x1] }
  0xdd   : > { %v867_v46 = vshrl.u32 %v866_v34, 7  ;;  %v861_v12 = vld [vmem:[%s2875_s7] sm:$0x1] }
  0xde   : > { %v854_v24 = vsub.f32 0.0, %v853_v5 }
  0xdf   : > { %v868_v17 = vsub.s32 0, %v867_v46 }
  0xe0   : > { %v855_v26 = vmul.f32 1.442695, %v854_v24 }
  0xe2   : > { %2042 = vpow2.f32 %v855_v26 }
  0xef   : > { %v2043_v39 = vpop.eup %2042 }
  0xf0   : > { %v857_v28 = vadd.f32 1.0, %v2043_v39 }
  0xf2   : > { %2044 = vlog2.f32 %v857_v28 }
  0xff   : > { %v2045_v11 = vpop.eup %2044 }
 0x100   : > { %v859_v61 = vmul.f32 0.6931472, %v2045_v11 }
 0x102   : > { %v860_v52 = vadd.f32 %v859_v61, %v852_v44 }
 0x104   : > { %v863_v51 = vmul.f32 %v862_v25, %v860_v52 }
 0x106   : > { %v864_v16 = vadd.f32 %v863_v51, %v861_v12 }
 0x108   : > { %v869_v22 = vrot.slane %v864_v16, %v868_v17 }
 0x10a   : > { %872 = vst [vmem:[%s3223_s25] sm:$0xff] %v869_v22  ;;  %873 = vst [vmem:[%s3223_s25 + $0x8] sm:$0xff] %v869_v22 }
 0x10b PF: > { %s3728_s9 = sld [smem:[#allocation23_spill]] }
 0x111   : > { %p876_p2 = scmp.eq.s32.totalorder %s3728_s9, 0 }
 0x113   : > { %p877_p1 = pnand %p876_p2, %p847_p5 }
 0x115   : > { %880 = sbr.rel (%p877_p1) target bundleno = 374 (0x176), region = 72 }
 0x11a   : > { %v882_v27 = vld [vmem:[%s2880_s18] sm:$0x1] }
 0x11b   : > { %v884_v5 = vand.u32 2147483647, %v882_v27  ;;  %v883_v16 = vmax.f32 %v882_v27, 0.0  ;;  %v881_v44 = vld [vmem:[%s2885_s17] sm:$0x1] }
 0x11c   : > { %v892_v61 = vld [vmem:[%s2875_s7] sm:$0x1]  ;;  %v897_v51 = vmul.f32 %v881_v44, %v881_v44 }
 0x11d   : > { %v885_v24 = vsub.f32 0.0, %v884_v5 }
 0x11f   : > { %v886_v26 = vmul.f32 1.442695, %v885_v24  ;;  %v898_v24 = vmul.f32 0.5, %v897_v51 }
 0x121   : > { %2046 = vpow2.f32 %v886_v26 }
 0x12e   : > { %v2047_v39 = vpop.eup %2046 }
 0x12f   : > { %v888_v28 = vadd.f32 1.0, %v2047_v39 }
 0x131   : > { %2048 = vlog2.f32 %v888_v28  ;;  %v912_v28 = vld [vmem:[%s3231_s5] sm:$0x1] }
 0x13e   : > { %v2049_v17 = vpop.eup %2048 }
 0x13f   : > { %v890_v34 = vmul.f32 0.6931472, %v2049_v17 }
 0x141   : > { %v891_v11 = vadd.f32 %v890_v34, %v883_v16 }
 0x143   : > { %v893_v46 = vmul.f32 %v891_v11, %v881_v44  ;;  %2050 = vlog2.f32 %v891_v11 }
 0x145   : > { %v894_v25 = vadd.f32 %v893_v46, %v892_v61 }
 0x147   : > { %v901_v52 = vmul.f32 %v894_v25, %v894_v25  ;;  %v915_v25 = vld [vmem:[%s3227_s29] sm:$0x1] }
 0x149   : > { %v902_v12 = vsub.f32 0.0, %v901_v52 }
 0x14b   : > { %v904_v22 = vmul.f32 81376.9, %v902_v12  ;;  %v903_v61 = vmul.f32 0.5, %v902_v12 }
 0x14d   : > { %v905_v5 = vmul.f32 1.442695, %v904_v22 }
 0x14f   : > { %2052 = vpow2.f32 %v905_v5 }
 0x150   : > { %v2051_v26 = vpop.eup %2050 }
 0x151   : > { %v896_v27 = vmul.f32 0.6931472, %v2051_v26 }
 0x153   : > { %v899_v39 = vadd.f32 %v898_v24, %v896_v27 }
 0x155   : > { %v900_v17 = vsub.f32 0.0, %v899_v39 }
 0x157   : > { %v913_v16 = vadd.f32 %v912_v28, %v900_v17 }
 0x159   : > { %914 = vst [vmem:[%s3231_s5] sm:$0x1] %v913_v16 }
 0x15c   : > { %v2053_v34 = vpop.eup %2052 }
 0x15d   : > { %v907_v47 = vmul.f32 201.7144, %v2053_v34 }
 0x15f   : > { %v908_v11 = vadd.f32 0.5, %v907_v47 }
 0x161   : > { %2054 = vlog2.f32 %v908_v11 }
 0x16e   : > { %v2055_v46 = vpop.eup %2054 }
 0x16f   : > { %v910_v44 = vmul.f32 0.6931472, %v2055_v46 }
 0x171   : > { %v911_v52 = vadd.f32 %v910_v44, %v903_v61 }
 0x173   : > { %v916_v51 = vadd.f32 %v915_v25, %v911_v52 }
 0x175   : > { %917 = vst [vmem:[%s3227_s29] sm:$0x1] %v916_v51 }
 0x176 PF: > { %v929_v22 = vpack.c.bf16 %v3219_v14, %v3217_v13  ;;  %v2499_v5 = vmov 0.0   ;;  %vm2500_vm0 = vmmov 0   ;;  %v928_v47 = vpack.c.bf16 %v3215_v23, %v3209_v57  ;;  %v2056_v17 = vld [vmem:[%s464_s0] sm:$0xff]   ;;  %v918_v16 = vld [vmem:[%s3223_s25] sm:$0xff]  ;;  %s3730_s17 = sld [smem:[#allocation23_spill]] }
 0x177   : > { %1782 = vmatprep.subr.bf16.mxu0 %v2499_v5  ;;  %1798 = vmatprep.mubr.msk.bf16.mxu0 %vm2500_vm0, %v2499_v5  ;;  %v927_v12 = vpack.c.bf16 %v3203_v50, %v3194_v19  ;;  %v926_v24 = vpack.c.bf16 %v3185_v4, %v3176_v8  ;;  %v925_v26 = vpack.c.bf16 %v3169_v40, %v3161_v20  ;;  %v919_v46 = vld [vmem:[%s3223_s25 + $0x8] sm:$0xff] }
 0x178   : > { %1783 = vmatpush3.bf16.xpose.msra.mxu0 %v929_v22  ;;  %v924_v27 = vpack.c.bf16 %v3154_v18, %v3147_v29  ;;  %v923_v39 = vpack.c.bf16 %v3140_v56, %v3133_v55  ;;  %v922_v28 = vpack.c.bf16 %v3126_v32, %v3119_v41 }
 0x179   : > { %1784 = vmatprep.subr.bf16.mxu0 %v2499_v5 }
 0x17c   : > { %p1638_p12 = scmp.ne.s32.totalorder %s3730_s17, 0 }
 0x180   : > { %1785 = vmatpush3.bf16.xpose.msra.mxu0 %v928_v47 }
 0x181   : > { %1786 = vmatprep.subr.bf16.mxu0 %v2499_v5 }
 0x188   : > { %1787 = vmatpush3.bf16.xpose.msra.mxu0 %v927_v12 }
 0x189   : > { %1788 = vmatprep.subr.bf16.mxu0 %v2499_v5 }
 0x190   : > { %1789 = vmatpush3.bf16.xpose.msra.mxu0 %v926_v24 }
 0x191   : > { %1790 = vmatprep.subr.bf16.mxu0 %v2499_v5 }
 0x198   : > { %1791 = vmatpush3.bf16.xpose.msra.mxu0 %v925_v26 }
 0x199   : > { %1792 = vmatprep.subr.bf16.mxu0 %v2499_v5 }
 0x1a0   : > { %1793 = vmatpush3.bf16.xpose.msra.mxu0 %v924_v27 }
 0x1a1   : > { %1794 = vmatprep.subr.bf16.mxu0 %v2499_v5 }
 0x1a8   : > { %1795 = vmatpush3.bf16.xpose.msra.mxu0 %v923_v39 }
 0x1a9   : > { %1796 = vmatprep.subr.bf16.mxu0 %v2499_v5 }
 0x1b0   : > { %1797 = vmatpush3.bf16.xpose.msra.mxu0 %v922_v28 }
 0x1b7   : > { %1799 = vmatmul.mubr.bf16.vlgmr.msra.gmra.mxu0 %v2056_v17 }
 0x277   : > { %v970_v34 = vpop.f32.mrf.mxu0 }
 0x278   : > { %v977_v11 = vadd.f32 %v970_v34, %v918_v16 }
 0x279   : > { %v1800_v61 = vpop.f32.mrf.mxu0 }
 0x27a   : > { %979 = vst [vmem:[%s3223_s25] sm:$0xff] %v977_v11  ;;  %983 = sbr.rel (%p1638_p12) target bundleno = 745 (0x2e9), region = 76 }
 0x27b   : > { %v973_v44 = vpop.f32.mrf.mxu0 }
 0x27c   : > { %v978_v25 = vadd.f32 %v973_v44, %v919_v46 }
 0x27d   : > { %v1801_v52 = vpop.f32.mrf.mxu0 }
 0x27e   : > { %980 = vst [vmem:[%s3223_s25 + $0x8] sm:$0xff] %v978_v25 }
 0x27f   : > { %2057 = vlog2.f32 %v3093_v45  ;;  %v3277_v51 = vmul.f32 %v3119_v41, %v3119_v41  ;;  %v3282_v22 = vmul.f32 %v3126_v32, %v3126_v32  ;;  %v3286_v5 = vmul.f32 %v3133_v55, %v3133_v55 }
 0x280   : > { %2059 = vlog2.f32 %v3098_v21  ;;  %v3297_v41 = vmul.f32 %v3140_v56, %v3140_v56  ;;  %v3311_v39 = vmul.f32 %v3147_v29, %v3147_v29  ;;  %v1024_v28 = vmul.f32 %v2967_v37, %v2967_v37 }
 0x281   : > { %v992_v47 = vsub.f32 0.0, %v3277_v51  ;;  %2061 = vlog2.f32 %v3103_v36  ;;  %v1011_v45 = vsub.f32 0.0, %v3282_v22  ;;  %v1030_v12 = vsub.f32 0.0, %v3286_v5 }
 0x282   : > { %2063 = vlog2.f32 %v3109_v60  ;;  %v986_v36 = vmul.f32 %v2962_v31, %v2962_v31  ;;  %v1049_v26 = vsub.f32 0.0, %v3297_v41  ;;  %v1005_v60 = vmul.f32 %v2965_v35, %v2965_v35 }
 0x283   : > { %v994_v21 = vmul.f32 81376.9, %v992_v47  ;;  %v1013_v32 = vmul.f32 81376.9, %v1011_v45  ;;  %v1032_v55 = vmul.f32 81376.9, %v1030_v12  ;;  %2065 = vlog2.f32 %v3115_v30 }
 0x284   : > { %v1051_v31 = vmul.f32 81376.9, %v1049_v26  ;;  %v1043_v30 = vmul.f32 %v2969_v38, %v2969_v38  ;;  %v1068_v17 = vsub.f32 0.0, %v3311_v39  ;;  %v3322_v35 = vmul.f32 %v3154_v18, %v3154_v18 }
 0x285   : > { %v995_v24 = vmul.f32 1.442695, %v994_v21  ;;  %v1014_v27 = vmul.f32 1.442695, %v1013_v32  ;;  %v1033_v56 = vmul.f32 1.442695, %v1032_v55  ;;  %v1062_v38 = vmul.f32 %v2972_v42, %v2972_v42 }
 0x286   : > { %v987_v16 = vmul.f32 0.5, %v986_v36  ;;  %v1052_v29 = vmul.f32 1.442695, %v1051_v31  ;;  %v1006_v34 = vmul.f32 0.5, %v1005_v60  ;;  %v1070_v37 = vmul.f32 81376.9, %v1068_v17 }
 0x287   : > { %2067 = vpow2.f32 %v995_v24  ;;  %v1087_v11 = vsub.f32 0.0, %v3322_v35  ;;  %v1025_v61 = vmul.f32 0.5, %v1024_v28  ;;  %v3332_v18 = vmul.f32 %v3161_v20, %v3161_v20 }
 0x288   : > { %2069 = vpow2.f32 %v1014_v27  ;;  %v1044_v44 = vmul.f32 0.5, %v1043_v30  ;;  %v1071_v25 = vmul.f32 1.442695, %v1070_v37  ;;  %v1081_v32 = vmul.f32 %v2974_v43, %v2974_v43 }
 0x289   : > { %2071 = vpow2.f32 %v1033_v56  ;;  %v1089_v52 = vmul.f32 81376.9, %v1087_v11  ;;  %v1106_v55 = vsub.f32 0.0, %v3332_v18  ;;  %v3343_v24 = vmul.f32 %v3169_v40, %v3169_v40 }
 0x28a   : > { %2073 = vlog2.f32 %v3122_v33  ;;  %v1063_v56 = vmul.f32 0.5, %v1062_v38  ;;  %v1100_v37 = vmul.f32 %v2977_v48, %v2977_v48  ;;  %v3357_v48 = vmul.f32 %v3176_v8, %v3176_v8 }
 0x28b   : > { %2075 = vpow2.f32 %v1052_v29  ;;  %v1090_v36 = vmul.f32 1.442695, %v1089_v52  ;;  %v1108_v28 = vmul.f32 81376.9, %v1106_v55  ;;  %v3384_v22 = vmul.f32 %v3194_v19, %v3194_v19 }
 0x28c   : > { %v2058_v46 = vpop.eup %2057  ;;  %2077 = vlog2.f32 %v3129_v3  ;;  %v3398_v39 = vmul.f32 %v3203_v50, %v3203_v50  ;;  %v1176_v35 = vmul.f32 %v2987_v58, %v2987_v58  ;;  %v1195_v58 = vmul.f32 %v2989_v59, %v2989_v59 }
 0x28d   : > { %v2060_v33 = vpop.eup %2059  ;;  %v985_v21 = vmul.f32 0.6931472, %v2058_v46  ;;  %2079 = vlog2.f32 %v3136_v0  ;;  %v1125_v0 = vsub.f32 0.0, %v3343_v24  ;;  %v1109_v46 = vmul.f32 1.442695, %v1108_v28 }
 0x28e   : > { %v2062_v42 = vpop.eup %2061  ;;  %v1004_v20 = vmul.f32 0.6931472, %v2060_v33  ;;  %2081 = vpow2.f32 %v1071_v25  ;;  %v1119_v33 = vmul.f32 %v2979_v49, %v2979_v49  ;;  %v3436_v18 = vmul.f32 %v3217_v13, %v3217_v13 }
 0x28f   : > { %v2064_v60 = vpop.eup %2063  ;;  %v988_v27 = vadd.f32 %v987_v16, %v985_v21  ;;  %v1023_v3 = vmul.f32 0.6931472, %v2062_v42  ;;  %2083 = vpow2.f32 %v1090_v36  ;;  %v1127_v16 = vmul.f32 81376.9, %v1125_v0 }
 0x290   : > { %v1007_v43 = vadd.f32 %v1006_v34, %v1004_v20  ;;  %v1042_v31 = vmul.f32 0.6931472, %v2064_v60  ;;  %v2066_v40 = vpop.eup %2065  ;;  %2085 = vlog2.f32 %v3143_v1 }
 0x291   : > { %v989_v30 = vsub.f32 0.0, %v988_v27  ;;  %v1026_v29 = vadd.f32 %v1025_v61, %v1023_v3  ;;  %v1061_v34 = vmul.f32 0.6931472, %v2066_v40  ;;  %2087 = vpow2.f32 %v1109_v46 }
 0x292   : > { %v1008_v25 = vsub.f32 0.0, %v1007_v43  ;;  %v1045_v52 = vadd.f32 %v1044_v44, %v1042_v31  ;;  %v1128_v20 = vmul.f32 1.442695, %v1127_v16  ;;  %v1082_v27 = vmul.f32 0.5, %v1081_v32 }
 0x293   : > { %v1027_v38 = vsub.f32 0.0, %v1026_v29  ;;  %v1064_v60 = vadd.f32 %v1063_v56, %v1061_v34  ;;  %v1101_v3 = vmul.f32 0.5, %v1100_v37  ;;  %v1144_v31 = vsub.f32 0.0, %v3357_v48 }
 0x294   : > { %v2068_v21 = vpop.eup %2067  ;;  %v1009_v61 = vadd.f32 %v1008_v25, %v989_v30  ;;  %v1046_v42 = vsub.f32 0.0, %v1045_v52  ;;  %2089 = vpow2.f32 %v1128_v20  ;;  %v1120_v40 = vmul.f32 0.5, %v1119_v33 }
 0x295   : > { %v2070_v44 = vpop.eup %2069  ;;  %v997_v36 = vmul.f32 201.7144, %v2068_v21  ;;  %v1065_v46 = vsub.f32 0.0, %v1064_v60  ;;  %2091 = vlog2.f32 %v3150_v6 }
 0x296   : > { %v2072_v1 = vpop.eup %2071  ;;  %v1016_v28 = vmul.f32 201.7144, %v2070_v44  ;;  %v1028_v43 = vadd.f32 %v1027_v38, %v1009_v61  ;;  %v1146_v38 = vmul.f32 81376.9, %v1144_v31 }
 0x297   : > { %v2074_v49 = vpop.eup %2073  ;;  %v998_v29 = vadd.f32 0.5, %v997_v36  ;;  %v1035_v30 = vmul.f32 201.7144, %v2072_v1 }
 0x298   : > { %v2076_v25 = vpop.eup %2075  ;;  %v1017_v52 = vadd.f32 0.5, %v1016_v28  ;;  %v1047_v8 = vadd.f32 %v1046_v42, %v1028_v43  ;;  %v1080_v16 = vmul.f32 0.6931472, %v2074_v49  ;;  %v1147_v42 = vmul.f32 1.442695, %v1146_v38 }
 0x299   : > { %v2078_v56 = vpop.eup %2077  ;;  %2093 = vlog2.f32 %v998_v29  ;;  %v1036_v32 = vadd.f32 0.5, %v1035_v30  ;;  %v1054_v37 = vmul.f32 201.7144, %v2076_v25  ;;  %v3365_v43 = vmul.f32 %v3185_v4, %v3185_v4 }
 0x29a   : > { %v2080_v34 = vpop.eup %2079  ;;  %2095 = vlog2.f32 %v1017_v52  ;;  %v1066_v21 = vadd.f32 %v1065_v46, %v1047_v8  ;;  %v1083_v61 = vadd.f32 %v1082_v27, %v1080_v16  ;;  %v1099_v20 = vmul.f32 0.6931472, %v2078_v56 }
 0x29b   : > { %v2082_v44 = vpop.eup %2081  ;;  %2097 = vlog2.f32 %v1036_v32  ;;  %v1055_v33 = vadd.f32 0.5, %v1054_v37  ;;  %v1118_v36 = vmul.f32 0.6931472, %v2080_v34  ;;  %v1138_v27 = vmul.f32 %v2982_v53, %v2982_v53 }
 0x29c   : > { %v1073_v60 = vmul.f32 201.7144, %v2082_v44  ;;  %v1084_v1 = vsub.f32 0.0, %v1083_v61  ;;  %v1102_v6 = vadd.f32 %v1101_v3, %v1099_v20  ;;  %v2084_v28 = vpop.eup %2083  ;;  %v1163_v8 = vsub.f32 0.0, %v3365_v43 }
 0x29d   : > { %2099 = vlog2.f32 %v1055_v33  ;;  %v1092_v29 = vmul.f32 201.7144, %v2084_v28  ;;  %v1121_v30 = vadd.f32 %v1120_v40, %v1118_v36  ;;  %v2086_v46 = vpop.eup %2085  ;;  %v993_v3 = vmul.f32 0.5, %v992_v47 }
 0x29e   : > { %v1074_v49 = vadd.f32 0.5, %v1073_v60  ;;  %v1085_v25 = vadd.f32 %v1084_v1, %v1066_v21  ;;  %v1103_v52 = vsub.f32 0.0, %v1102_v6  ;;  %2101 = vpow2.f32 %v1147_v42  ;;  %v2088_v16 = vpop.eup %2087 }
 0x29f   : > { %v1012_v4 = vmul.f32 0.5, %v1011_v45  ;;  %v1031_v56 = vmul.f32 0.5, %v1030_v12  ;;  %v1093_v40 = vadd.f32 0.5, %v1092_v29  ;;  %v1111_v32 = vmul.f32 201.7144, %v2088_v16 }
 0x2a0   : > { %2103 = vlog2.f32 %v1074_v49  ;;  %v1157_v53 = vmul.f32 %v2984_v54, %v2984_v54  ;;  %v1165_v37 = vmul.f32 81376.9, %v1163_v8  ;;  %v1050_v38 = vmul.f32 0.5, %v1049_v26 }
 0x2a1   : > { %v1137_v51 = vmul.f32 0.6931472, %v2086_v46  ;;  %v1139_v47 = vmul.f32 0.5, %v1138_v27  ;;  %v2090_v5 = vpop.eup %2089  ;;  %v3388_v45 = vmul.f32 0.5, %v1068_v17  ;;  %v1104_v12 = vadd.f32 %v1103_v52, %v1085_v25 }
 0x2a2   : > { %v1122_v34 = vsub.f32 0.0, %v1121_v30  ;;  %v1166_v54 = vmul.f32 1.442695, %v1165_v37  ;;  %v3392_v21 = vmul.f32 0.5, %v1087_v11  ;;  %v1112_v41 = vadd.f32 0.5, %v1111_v32  ;;  %v2092_v61 = vpop.eup %2091 }
 0x2a3   : > { %2105 = vlog2.f32 %v3157_v2  ;;  %v1182_v26 = vsub.f32 0.0, %v3384_v22  ;;  %v1130_v19 = vmul.f32 201.7144, %v2090_v5  ;;  %v1158_v20 = vmul.f32 0.5, %v1157_v53 }
 0x2a4   : > { %2107 = vlog2.f32 %v1093_v40  ;;  %v1140_v44 = vadd.f32 %v1139_v47, %v1137_v51  ;;  %v1123_v36 = vadd.f32 %v1122_v34, %v1104_v12  ;;  %v1201_v42 = vsub.f32 0.0, %v3398_v39 }
 0x2a5   : > { %2109 = vpow2.f32 %v1166_v54  ;;  %v1184_v11 = vmul.f32 81376.9, %v1182_v26  ;;  %v1156_v50 = vmul.f32 0.6931472, %v2092_v61  ;;  %v1131_v29 = vadd.f32 0.5, %v1130_v19 }
 0x2a6   : > { %v2094_v17 = vpop.eup %2093  ;;  %2111 = vlog2.f32 %v3164_v9  ;;  %v1141_v46 = vsub.f32 0.0, %v1140_v44  ;;  %v1203_v9 = vmul.f32 81376.9, %v1201_v42  ;;  %v3413_v16 = vmul.f32 %v3209_v57, %v3209_v57 }
 0x2a7   : > { %v2096_v2 = vpop.eup %2095  ;;  %v1000_v33 = vmul.f32 0.6931472, %v2094_v17  ;;  %2113 = vlog2.f32 %v1112_v41  ;;  %v1185_v6 = vmul.f32 1.442695, %v1184_v11  ;;  %v1159_v32 = vadd.f32 %v1158_v20, %v1156_v50 }
 0x2a8   : > { %v2098_v60 = vpop.eup %2097  ;;  %v1019_v1 = vmul.f32 0.6931472, %v2096_v2  ;;  %v1204_v53 = vmul.f32 1.442695, %v1203_v9  ;;  %v1220_v37 = vsub.f32 0.0, %v3413_v16  ;;  %v1177_v47 = vmul.f32 0.5, %v1176_v35 }
 0x2a9   : > { %v1001_v28 = vadd.f32 %v1000_v33, %v993_v3  ;;  %v1038_v49 = vmul.f32 0.6931472, %v2098_v60  ;;  %2115 = vpow2.f32 %v1185_v6  ;;  %v1142_v34 = vadd.f32 %v1141_v46, %v1123_v36  ;;  %v3732_v46 = vld [vmem:[#allocation36_spill] sm:$0xff] }
 0x2aa   : > { %v2100_v30 = vpop.eup %2099  ;;  %v1020_v27 = vadd.f32 %v1019_v1, %v1012_v4  ;;  %2117 = vlog2.f32 %v3172_v7  ;;  %v1222_v12 = vmul.f32 81376.9, %v1220_v37  ;;  %v1160_v54 = vsub.f32 0.0, %v1159_v32 }
 0x2ab   : > { %v1039_v25 = vadd.f32 %v1038_v49, %v1031_v56  ;;  %v1057_v52 = vmul.f32 0.6931472, %v2100_v30  ;;  %v2102_v3 = vpop.eup %2101  ;;  %2119 = vlog2.f32 %v3179_v15  ;;  %v3419_v56 = vmul.f32 %v3215_v23, %v3215_v23 }
 0x2ac   : > { %v1021_v40 = vadd.f32 %v1020_v27, %v1001_v28  ;;  %2121 = vlog2.f32 %v1131_v29  ;;  %v1149_v4 = vmul.f32 201.7144, %v2102_v3  ;;  %v1214_v41 = vmul.f32 %v2991_v62, %v2991_v62 }
 0x2ad   : > { %v2104_v59 = vpop.eup %2103  ;;  %v1058_v51 = vadd.f32 %v1057_v52, %v1050_v38  ;;  %2123 = vpow2.f32 %v1204_v53  ;;  %v1239_v15 = vsub.f32 0.0, %v3419_v56  ;;  %v1107_v38 = vmul.f32 0.5, %v1106_v55  ;;  %v1291_v56 = vld [vmem:[%s3227_s29] sm:$0xff] }
 0x2ae   : > { %v1040_v7 = vadd.f32 %v1039_v25, %v1021_v40  ;;  %v1076_v57 = vmul.f32 0.6931472, %v2104_v59  ;;  %v1150_v5 = vadd.f32 0.5, %v1149_v4  ;;  %2125 = vlog2.f32 %v3188_v10 }
 0x2af   : > { %v1196_v61 = vmul.f32 0.5, %v1195_v58  ;;  %v1223_v19 = vmul.f32 1.442695, %v1222_v12  ;;  %v1241_v20 = vmul.f32 81376.9, %v1239_v15  ;;  %v1233_v11 = vmul.f32 %v2993_v63, %v2993_v63  ;;  %v3731_v58 = vld [vmem:[#allocation38_spill] sm:$0xff] }
 0x2b0   : > { %v2106_v23 = vpop.eup %2105  ;;  %v1059_v44 = vadd.f32 %v1058_v51, %v1040_v7  ;;  %2127 = vlog2.f32 %v1150_v5  ;;  %v1077_v62 = vadd.f32 %v1076_v57, %v3388_v45  ;;  %v1161_v33 = vadd.f32 %v1160_v54, %v1142_v34 }
 0x2b1   : > { %v2108_v17 = vpop.eup %2107  ;;  %v1175_v35 = vmul.f32 0.6931472, %v2106_v23  ;;  %2129 = vpow2.f32 %v1223_v19  ;;  %v1242_v10 = vmul.f32 1.442695, %v1241_v20  ;;  %v1215_v1 = vmul.f32 0.5, %v1214_v41 }
 0x2b2   : > { %v2110_v2 = vpop.eup %2109  ;;  %v1095_v6 = vmul.f32 0.6931472, %v2108_v17  ;;  %v1258_v63 = vsub.f32 0.0, %v3436_v18  ;;  %v1234_v45 = vmul.f32 0.5, %v1233_v11  ;;  %v1078_v27 = vadd.f32 %v1077_v62, %v1059_v44 }
 0x2b3   : > { %v2112_v55 = vpop.eup %2111  ;;  %v1168_v36 = vmul.f32 201.7144, %v2110_v2  ;;  %v1178_v60 = vadd.f32 %v1177_v47, %v1175_v35  ;;  %2131 = vpow2.f32 %v1242_v10  ;;  %v1252_v9 = vmul.f32 %v3732_v46, %v3732_v46 }
 0x2b4   : > { %v2114_v50 = vpop.eup %2113  ;;  %v1194_v28 = vmul.f32 0.6931472, %v2112_v55  ;;  %2133 = vlog2.f32 %v3731_v58  ;;  %v1260_v25 = vmul.f32 81376.9, %v1258_v63  ;;  %v1096_v59 = vadd.f32 %v1095_v6, %v3392_v21 }
 0x2b5   : > { %v1169_v49 = vadd.f32 0.5, %v1168_v36  ;;  %v1179_v29 = vsub.f32 0.0, %v1178_v60  ;;  %v1114_v3 = vmul.f32 0.6931472, %v2114_v50  ;;  %v1126_v57 = vmul.f32 0.5, %v1125_v0 }
 0x2b6   : > { %v2116_v30 = vpop.eup %2115  ;;  %v1197_v13 = vadd.f32 %v1196_v61, %v1194_v28  ;;  %v1261_v51 = vmul.f32 1.442695, %v1260_v25  ;;  %v3449_v34 = vmul.f32 %v3219_v14, %v3219_v14  ;;  %v1253_v61 = vmul.f32 0.5, %v1252_v9  ;;  %v3733_v14 = vld [vmem:[#allocation37_spill] sm:$0xff] }
 0x2b7   : > { %v2118_v52 = vpop.eup %2117  ;;  %2135 = vlog2.f32 %v1169_v49  ;;  %v1180_v40 = vadd.f32 %v1179_v29, %v1161_v33  ;;  %v1187_v32 = vmul.f32 201.7144, %v2116_v30  ;;  %v1097_v44 = vadd.f32 %v1096_v59, %v1078_v27 }
 0x2b8   : > { %v2120_v53 = vpop.eup %2119  ;;  %v1198_v4 = vsub.f32 0.0, %v1197_v13  ;;  %v1213_v7 = vmul.f32 0.6931472, %v2118_v52  ;;  %2137 = vpow2.f32 %v1261_v51  ;;  %v1277_v20 = vsub.f32 0.0, %v3449_v34 }
 0x2b9   : > { %v2122_v47 = vpop.eup %2121  ;;  %v1188_v5 = vadd.f32 0.5, %v1187_v32  ;;  %v1232_v12 = vmul.f32 0.6931472, %v2120_v53  ;;  %v1115_v24 = vadd.f32 %v1114_v3, %v1107_v38  ;;  %v1271_v10 = vmul.f32 %v3733_v14, %v3733_v14 }
 0x2ba   : > { %v2124_v54 = vpop.eup %2123  ;;  %v1199_v41 = vadd.f32 %v1198_v4, %v1180_v40  ;;  %v1216_v23 = vadd.f32 %v1215_v1, %v1213_v7  ;;  %v1133_v0 = vmul.f32 0.6931472, %v2122_v47  ;;  %v1279_v36 = vmul.f32 81376.9, %v1277_v20 }
 0x2bb   : > { %2139 = vlog2.f32 %v1188_v5  ;;  %v1206_v21 = vmul.f32 201.7144, %v2124_v54  ;;  %v1235_v19 = vadd.f32 %v1234_v45, %v1232_v12  ;;  %v2126_v17 = vpop.eup %2125  ;;  %v1116_v50 = vadd.f32 %v1115_v24, %v1097_v44 }
 0x2bc   : > { %v1217_v35 = vsub.f32 0.0, %v1216_v23  ;;  %v1251_v62 = vmul.f32 0.6931472, %v2126_v17  ;;  %v1145_v38 = vmul.f32 0.5, %v1144_v31  ;;  %v1280_v28 = vmul.f32 1.442695, %v1279_v36 }
 0x2bd   : > { %v1207_v11 = vadd.f32 0.5, %v1206_v21  ;;  %v1236_v2 = vsub.f32 0.0, %v1235_v19  ;;  %v2128_v55 = vpop.eup %2127  ;;  %v1134_v29 = vadd.f32 %v1133_v0, %v1126_v57  ;;  %v1272_v30 = vmul.f32 0.5, %v1271_v10  ;;  %v1288_v57 = vld [vmem:[%s3231_s5] sm:$0xff] }
 0x2be   : > { %v1218_v33 = vadd.f32 %v1217_v35, %v1199_v41  ;;  %v2130_v60 = vpop.eup %2129  ;;  %v1254_v1 = vadd.f32 %v1253_v61, %v1251_v62  ;;  %v1152_v13 = vmul.f32 0.6931472, %v2128_v55  ;;  %v1164_v48 = vmul.f32 0.5, %v1163_v8 }
 0x2bf   : > { %2141 = vlog2.f32 %v1207_v11  ;;  %v1225_v6 = vmul.f32 201.7144, %v2130_v60  ;;  %v1135_v32 = vadd.f32 %v1134_v29, %v1116_v50  ;;  %v1183_v5 = vmul.f32 0.5, %v1182_v26 }
 0x2c0   : > { %v2132_v49 = vpop.eup %2131  ;;  %v1237_v45 = vadd.f32 %v1236_v2, %v1218_v33  ;;  %v1255_v58 = vsub.f32 0.0, %v1254_v1  ;;  %2143 = vpow2.f32 %v1280_v28  ;;  %v1153_v53 = vadd.f32 %v1152_v13, %v1145_v38 }
 0x2c1   : > { %v2134_v27 = vpop.eup %2133  ;;  %v1226_v46 = vadd.f32 0.5, %v1225_v6  ;;  %v1244_v9 = vmul.f32 201.7144, %v2132_v49  ;;  %v1202_v17 = vmul.f32 0.5, %v1201_v42  ;;  %v1221_v22 = vmul.f32 0.5, %v1220_v37 }
 0x2c2   : > { %v1270_v25 = vmul.f32 0.6931472, %v2134_v27  ;;  %v1256_v31 = vadd.f32 %v1255_v58, %v1237_v45  ;;  %v1154_v54 = vadd.f32 %v1153_v53, %v1135_v32  ;;  %v1240_v39 = vmul.f32 0.5, %v1239_v15 }
 0x2c3   : > { %2145 = vlog2.f32 %v1226_v46  ;;  %v1245_v3 = vadd.f32 0.5, %v1244_v9  ;;  %v1259_v16 = vmul.f32 0.5, %v1258_v63  ;;  %v1278_v38 = vmul.f32 0.5, %v1277_v20 }
 0x2c4   : > { %v2136_v52 = vpop.eup %2135  ;;  %v1273_v40 = vadd.f32 %v1272_v30, %v1270_v25 }
 0x2c5   : > { %v1171_v59 = vmul.f32 0.6931472, %v2136_v52  ;;  %2147 = vlog2.f32 %v1245_v3  ;;  %v2138_v4 = vpop.eup %2137 }
 0x2c6   : > { %v1274_v7 = vsub.f32 0.0, %v1273_v40  ;;  %v1263_v47 = vmul.f32 201.7144, %v2138_v4 }
 0x2c7   : > { %v1172_v41 = vadd.f32 %v1171_v59, %v1164_v48 }
 0x2c8   : > { %v2140_v51 = vpop.eup %2139  ;;  %v1275_v12 = vadd.f32 %v1274_v7, %v1256_v31  ;;  %v1264_v8 = vadd.f32 0.5, %v1263_v47 }
 0x2c9   : > { %v1190_v43 = vmul.f32 0.6931472, %v2140_v51  ;;  %v1173_v21 = vadd.f32 %v1172_v41, %v1154_v54 }
 0x2ca   : > { %v1289_v23 = vadd.f32 %v1288_v57, %v1275_v12  ;;  %2149 = vlog2.f32 %v1264_v8 }
 0x2cb   : > { %v1191_v19 = vadd.f32 %v1190_v43, %v1183_v5 }
 0x2cc   : > { %v2142_v61 = vpop.eup %2141  ;;  %1290 = vst [vmem:[%s3231_s5] sm:$0xff] %v1289_v23 }
 0x2cd   : > { %v1209_v44 = vmul.f32 0.6931472, %v2142_v61  ;;  %v2144_v24 = vpop.eup %2143  ;;  %v1192_v26 = vadd.f32 %v1191_v19, %v1173_v21 }
 0x2ce   : > { %v1282_v0 = vmul.f32 201.7144, %v2144_v24 }
 0x2cf   : > { %v1210_v11 = vadd.f32 %v1209_v44, %v1202_v17 }
 0x2d0   : > { %v2146_v35 = vpop.eup %2145  ;;  %v1283_v62 = vadd.f32 0.5, %v1282_v0 }
 0x2d1   : > { %v1228_v2 = vmul.f32 0.6931472, %v2146_v35  ;;  %v1211_v10 = vadd.f32 %v1210_v11, %v1192_v26 }
 0x2d2   : > { %v2148_v14 = vpop.eup %2147  ;;  %2151 = vlog2.f32 %v1283_v62 }
 0x2d3   : > { %v1229_v55 = vadd.f32 %v1228_v2, %v1221_v22  ;;  %v1247_v42 = vmul.f32 0.6931472, %v2148_v14 }
 0x2d5   : > { %v1230_v36 = vadd.f32 %v1229_v55, %v1211_v10  ;;  %v1248_v60 = vadd.f32 %v1247_v42, %v1240_v39 }
 0x2d7   : > { %v2150_v33 = vpop.eup %2149  ;;  %v1249_v1 = vadd.f32 %v1248_v60, %v1230_v36 }
 0x2d8   : > { %v1266_v37 = vmul.f32 0.6931472, %v2150_v33 }
 0x2da   : > { %v1267_v50 = vadd.f32 %v1266_v37, %v1259_v16 }
 0x2dc   : > { %v1268_v28 = vadd.f32 %v1267_v50, %v1249_v1 }
 0x2df   : > { %v2152_v6 = vpop.eup %2151 }
 0x2e0   : > { %v1285_v49 = vmul.f32 0.6931472, %v2152_v6 }
 0x2e2   : > { %v1286_v29 = vadd.f32 %v1285_v49, %v1278_v38 }
 0x2e4   : > { %v1287_v15 = vadd.f32 %v1286_v29, %v1268_v28 }
 0x2e6   : > { %v1292_v45 = vadd.f32 %v1291_v56, %v1287_v15 }
 0x2e8   : > { %1293 = vst [vmem:[%s3227_s29] sm:$0xff] %v1292_v45 }
 0x2e9 PF: > { %s3734_s8 = sld [smem:[#allocation23_spill]]  ;;  %s1338_s21 = sshll.u32 %s3227_s29, 4  ;;  %s1339_s21 = int_to_ptr.vmem [resolvable:$true] %s1338_s21 }
 0x2ea   : > { %s3735_s0 = sld [smem:[#allocation24_spill]]  ;;  %s3738_s18 = sand.u32 1, %s2711_s19  }
 0x2eb   : > { %s3736_s11 = sld [smem:[#allocation46_spill]]  ;;  %s3489_s22 = scalar_lea.sflag [#allocation12], %s3738_s18 }
 0x2ec   : > { %s2265_s26 = scalar_lea.vmem %s1339_s21, 128  ;;  %p3739_p10 = scmp.ne.s32.totalorder %s3702_s1, 0 }
 0x2ed   : > { %p2266_p8 = scmp.ne.s32.totalorder %s1339_s21, %s2265_s26  ;;  %s2501_s20 = smov [#allocation11]  }
 0x2ee   : > { %s2269_s9 = sshll.u32 %s2501_s20, 4  ;;  %s2270_s9 = int_to_ptr.vmem [resolvable:$false] %s2269_s9 }
 0x2ef   : > { %s1645_s28 = sshll.u32 %s3734_s8, 1  ;;  %p2267_p3 = pnand %p2266_p8, %p3739_p10 }
 0x2f0   : > { %s3478_s23 = sadd.s32 %s3735_s0, %s1645_s28  ;;  %s2271_s15 = scalar_lea.vmem %s2270_s9, 256 }
 0x2f1   : > { %s1646_s6 = sshll.u32 %s3478_s23, 7  ;;  %s3737_s27 = smov %s3736_s11 }
 0x2f2   : > { %s1336_s3 = scalar_lea.hbm %s3736_s11, %s1646_s6  ;;  %p2268_p11 = pneg %p2267_p3 }
 0x2f3   : > { %p2272_p7 = scmp.lt.s32.totalorder %s1339_s21, %s2270_s9  ;;  %p2273_p4 = scmp.lt.s32.totalorder %s2271_s15, %s2265_s26 }
 0x2f5   : > { %p2274_p9 = por %p2273_p4, %p2272_p7 }
 0x2f7   : > { %p2275_p13 = pnand %p2274_p9, %p2268_p11 }
 0x2f9   : > { %2278 = shalt.err (!%p2275_p13)
}
 0x2fa   : > { %s2279_s29 = scalar_lea.hbm %s1336_s3, 128  ;;  %s2283_s28 = scalar_lea.hbm %s3737_s27, 512 }
 0x2fb   : > { %p2280_p6 = scmp.ne.s32.totalorder %s1336_s3, %s2279_s29  ;;  %p2284_p2 = scmp.lt.s32.totalorder %s1336_s3, %s3737_s27 }
 0x2fc   : > { %p2285_p1 = scmp.lt.s32.totalorder %s2283_s28, %s2279_s29 }
 0x2fd   : > { %p2281_p5 = pnand %p2280_p6, %p3739_p10 }
 0x2fe   : > { %p2286_p12 = por %p2285_p1, %p2284_p2 }
 0x2ff   : > { %p2282_p0 = pneg %p2281_p5 }
 0x301   : > { %p2287_p8 = pnand %p2286_p12, %p2282_p0 }
 0x303   : > { %2290 = shalt.err (!%p2287_p8)
}
 0x304   : > { %1811 = dma.vmem_to_hbm [thread:$0]  (%p3739_p10), %s1339_s21, 128, %s1336_s3, %s3489_s22  }
 0x305   : > { %s1655_s11 = sshll.u32 %s3734_s8, 2  ;;  %s1320_s18 = sshll.u32 %s3223_s25, 4  ;;  %s3507_s18 = int_to_ptr.vmem [resolvable:$true] %s1320_s18 }
 0x306   : > { %s1317_s26 = sadd.s32 %s3735_s0, %s1655_s11  ;;  %s3740_s29 = sld [smem:[#allocation45_spill]] }
 0x307   : > { %s1644_s20 = sshll.u32 %s1317_s26, 7  ;;  %s3741_s4 = sld [smem:[#allocation47_spill]] }
 0x308   : > { %s1295_s8 = scalar_lea.sflag [#allocation4], %s2865_s12  ;;  %s2291_s25 = scalar_lea.vmem %s3507_s18, 256 }
 0x309   : > { %p2292_p3 = scmp.ne.s32.totalorder %s3507_s18, %s2291_s25  ;;  %s2502_s0 = smov [#allocation10]  }
 0x30a   : > { %s2295_s21 = sshll.u32 %s2502_s0, 4  ;;  %s2296_s21 = int_to_ptr.vmem [resolvable:$false] %s2295_s21 }
 0x30b   : > { %p2293_p11 = pnand %p2292_p3, %p3739_p10  ;;  %s2297_s3 = scalar_lea.vmem %s2296_s21, 512 }
 0x30c   : > { %s3512_s19 = scalar_lea.hbm %s3740_s29, %s1644_s20  ;;  %p2298_p4 = scmp.lt.s32.totalorder %s3507_s18, %s2296_s21 }
 0x30d   : > { %s3519_s7 = scalar_lea.hbm %s3741_s4, %s1646_s6  ;;  %p2294_p7 = pneg %p2293_p11 }
 0x30e   : > { %p2299_p9 = scmp.lt.s32.totalorder %s2297_s3, %s2291_s25 }
 0x310   : > { %p2300_p13 = por %p2299_p9, %p2298_p4 }
 0x312   : > { %p2301_p6 = pnand %p2300_p13, %p2294_p7 }
 0x314   : > { %2304 = shalt.err (!%p2301_p6)
}
 0x315   : > { %s2305_s23 = scalar_lea.hbm %s3512_s19, 256  ;;  %s2309_s26 = scalar_lea.hbm %s3740_s29, 1024 }
 0x316   : > { %p2306_p5 = scmp.ne.s32.totalorder %s3512_s19, %s2305_s23  ;;  %p2310_p1 = scmp.lt.s32.totalorder %s3512_s19, %s3740_s29 }
 0x317   : > { %p2311_p12 = scmp.lt.s32.totalorder %s2309_s26, %s2305_s23 }
 0x318   : > { %p2307_p0 = pnand %p2306_p5, %p3739_p10 }
 0x319   : > { %p2312_p8 = por %p2311_p12, %p2310_p1 }
 0x31a   : > { %p2308_p2 = pneg %p2307_p0 }
 0x31c   : > { %p2313_p3 = pnand %p2312_p8, %p2308_p2 }
 0x31e   : > { %2316 = shalt.err (!%p2313_p3)
}
 0x31f   : > { %s2503_s15 = smov 128   ;;  %s2504_s17 = smov 256  }
 0x320   : > { %s2505_s28 = smov 8   ;;  %s1353_s25 = sshll.u32 %s3231_s5, 4  ;;  %s1354_s25 = int_to_ptr.vmem [resolvable:$true] %s1353_s25 }
 0x321   : > { %1810 = dma.vmem_to_hbm [thread:$0]  (%p3739_p10), %s3507_s18, 256, %s3512_s19, %s1295_s8, %s2503_s15, %s2504_s17, %s2505_s28  }
 0x322   : > { %s2317_s0 = scalar_lea.vmem %s1354_s25, 128  ;;  %s2506_s21 = smov [#allocation13]  }
 0x323   : > { %p2318_p11 = scmp.ne.s32.totalorder %s1354_s25, %s2317_s0  ;;  %s2321_s3 = sshll.u32 %s2506_s21, 4  ;;  %s2322_s3 = int_to_ptr.vmem [resolvable:$false] %s2321_s3 }
 0x324   : > { %s2323_s23 = scalar_lea.vmem %s2322_s3, 256  ;;  %p2324_p9 = scmp.lt.s32.totalorder %s1354_s25, %s2322_s3 }
 0x325   : > { %p2319_p7 = pnand %p2318_p11, %p3739_p10  ;;  %p2325_p13 = scmp.lt.s32.totalorder %s2323_s23, %s2317_s0 }
 0x327   : > { %p2320_p4 = pneg %p2319_p7  ;;  %p2326_p6 = por %p2325_p13, %p2324_p9 }
 0x329   : > { %p2327_p5 = pnand %p2326_p6, %p2320_p4 }
 0x32b   : > { %2330 = shalt.err (!%p2327_p5)
}
 0x32c   : > { %s2331_s12 = scalar_lea.hbm %s3519_s7, 128  ;;  %s2335_s19 = scalar_lea.hbm %s3741_s4, 512 }
 0x32d   : > { %p2332_p0 = scmp.ne.s32.totalorder %s3519_s7, %s2331_s12  ;;  %p2336_p12 = scmp.lt.s32.totalorder %s3519_s7, %s3741_s4 }
 0x32e   : > { %p2337_p8 = scmp.lt.s32.totalorder %s2335_s19, %s2331_s12 }
 0x32f   : > { %p2333_p2 = pnand %p2332_p0, %p3739_p10 }
 0x330   : > { %p2338_p3 = por %p2337_p8, %p2336_p12 }
 0x331   : > { %p2334_p1 = pneg %p2333_p2 }
 0x333   : > { %p2339_p11 = pnand %p2338_p3, %p2334_p1 }
 0x335   : > { %2342 = shalt.err (!%p2339_p11)
}
 0x336   : > { %1812 = dma.vmem_to_hbm [thread:$0]  (%p3739_p10), %s1354_s25, 128, %s3519_s7, %s3489_s22  }
 0x337 PF: > { %p1840_p7 = scmp.ge.s32.totalorder %s2489_s24, 2  ;;  %s1365_s11 = sand.u32 1, %s2429_s30  }
 0x338   : > { %p3742_p4 = scmp.ne.s32.totalorder %s3704_s16, 0  ;;  %s1366_s26 = scalar_lea.sflag [#allocation4], %s1365_s11 }
 0x33a   : > { %p1830_p9 = pnand %p1840_p7, %p3742_p4 }
 0x33c   : > { %p1831_p13 = pneg %p1830_p9 }
 0x33e   : > { %2420 = dma.done.wait (%p1831_p13), %s1366_s26, 256  }
 0x33f   : > { %2422 = vsyncadd (%p1831_p13), %s1366_s26, 4294967040  ;;  %s3743_s20 = sadd.s32 4294967294, %s2489_s24  }
 0x340   : > { %s1374_s9 = sand.u32 1, %s3743_s20  }
 0x341   : > { %s1375_s15 = scalar_lea.sflag [#allocation12], %s1374_s9 }
 0x342   : > { %2424 = dma.done.wait (%p1831_p13), %s1375_s15, 256  }
 0x343   : > { %2426 = vsyncadd (%p1831_p13), %s1375_s15, 4294967040  ;;  %s35_s24 = sadd.s32 1, %s2489_s24   ;;  %s3745_s22 = sld [smem:[#allocation19_spill]] }
 0x344   : > { %p3569_p10 = scmp.ge.s32.totalorder %s35_s24, 10   ;;  %s3746_s11 = sld [smem:[#allocation35_spill]] }
 0x345   : > { %s3747_s16 = sld [smem:[#allocation34_spill]]  ;;  %s3757_s30 = smov %s2433_s10 }
 0x346   : > { %s3748_s15 = sld [smem:[#allocation20_spill]]  ;;  %s3759_s12 = smov %s2445_s13 }
 0x347   : > { %s3749_s7 = sld [smem:[#allocation21_spill]]  ;;  %s3760_s13 = smov %s2449_s14 }
 0x348   : > { %s3750_s17 = sld [smem:[#allocation33_spill]] }
 0x349   : > { %s3751_s18 = sld [smem:[#allocation25_spill]]  ;;  %s3758_s10 = smov %s3745_s22 }
 0x34a   : > { %s3752_s19 = sld [smem:[#allocation26_spill]] }
 0x34b   : > { %s3753_s20 = sld [smem:[#allocation27_spill]]  ;;  %s3761_s14 = smov %s3747_s16 }
 0x34c   : > { %s3754_s21 = sld [smem:[#allocation28_spill]] }
 0x34d   : > { %s3755_s28 = sld [smem:[#allocation29_spill]]  ;;  %s3762_s16 = smov %s3749_s7 }
 0x34e   : > { %s3756_s23 = sld [smem:[#allocation32_spill]] }
 0x34f   :  { %34 = sbr.rel (!%p3569_p10) target bundleno = 27 (0x1b), region = 183 }
 0x353   : > { %s3763_s22 = smov %s3755_s28 }
 0x354   :  { %1389 = vsyncpa [#allocation3], 1 }
 0x355   :  { %1391 = vsyncpa [#allocation3 + $0x1], 1 }
 0x356   :  { %1392 = vsyncpa [#allocation6], 1 }
 0x357   :  { %1394 = vsyncpa [#allocation6 + $0x1], 1 }
 0x358   :  { %1395 = vsyncpa [#allocation9], 1 }
 0x359   :  { %1397 = vsyncpa [#allocation9 + $0x1], 1 }
 0x35a   :  { %1398 = vsyncpa [#allocation4], 1 }
 0x35b   :  { %1400 = vsyncpa [#allocation4 + $0x1], 1 }
 0x35c   :  { %1401 = vsyncpa [#allocation12], 1 }
 0x35d   :  { %1403 = vsyncpa [#allocation12 + $0x1], 1 }

</bundles_post_ra>
